<compile_context>
chip_gen: v7x
topology: tpu7x:2x2x1
jax: 0.10.0
libtpu: 0.0.40
codegen_flags: <defaults>
</compile_context>

<pallas_src>
import functools

import jax
import jax.numpy as jnp
from jax.experimental import pallas as pl
from jax.experimental.pallas import tpu as pltpu


def _layernorm(x, w, b, eps=1e-5):
    mu = jnp.mean(x, axis=-1, keepdims=True)
    xc = x - mu
    var = jnp.mean(xc * xc, axis=-1, keepdims=True)
    return xc * jax.lax.rsqrt(var + eps) * w + b


def resblock_kernel(x_ref,
                    ln1_w_ref, ln1_b_ref,
                    in_w_ref, in_b_ref,
                    out_w_ref, out_b_ref,
                    ln2_w_ref, ln2_b_ref,
                    fc_w_ref, fc_b_ref,
                    proj_w_ref, proj_b_ref,
                    o_ref,
                    qkv_ref, ctx_ref,
                    *, heads, q_tile):
    """One grid step == one batch element's (L, W) slab."""
    f32 = jnp.float32
    bf16 = jnp.bfloat16

    x = x_ref[0].astype(f32)                                  # (L, W) f32
    L, W = x.shape
    dh = W // heads

    # ---------------- attention branch ----------------
    h = _layernorm(x, ln1_w_ref[...], ln1_b_ref[...])         # f32
    # in_w is pre-transposed (W, 3W) bf16 with 1/sqrt(dh) folded into the Q
    # columns; the bias has the scale folded into its Q part too.
    qkv = jnp.dot(h.astype(bf16), in_w_ref[...],
                  preferred_element_type=f32) + in_b_ref[...]  # (L, 3W) f32
    # Stage QKV in a bf16 VMEM scratch: per-head reads below become cheap ref
    # views and nothing large stays live across the head loop.
    qkv_ref[...] = qkv.astype(bf16)

    for hh in range(heads):                                   # static head loop
        k_h = qkv_ref[:, W + hh * dh: W + (hh + 1) * dh]      # (L, dh) bf16
        v_h = qkv_ref[:, 2 * W + hh * dh: 2 * W + (hh + 1) * dh]
        for q0 in range(0, L, q_tile):                        # static q tiling
            tq = min(q_tile, L - q0)
            q_h = qkv_ref[q0:q0 + tq, hh * dh:(hh + 1) * dh]  # (tq, dh) bf16
            # Contract over dh directly -- no K transpose is emitted.
            s = jax.lax.dot_general(
                q_h, k_h,
                dimension_numbers=(((1,), (1,)), ((), ())),
                preferred_element_type=f32)                   # (tq, L) f32
            s = s - jnp.max(s, axis=-1, keepdims=True)
            p = jnp.exp(s)                                    # f32 (EUP)
            inv = pl.reciprocal(jnp.sum(p, axis=-1, keepdims=True), approx=True)
            p = p * inv
            ctx_h = jnp.dot(p.astype(bf16), v_h,
                            preferred_element_type=f32)       # (tq, dh) f32
            # Persistent (L, W) scratch at static offsets instead of a Python
            # list + lane-concat.
            ctx_ref[q0:q0 + tq, hh * dh:(hh + 1) * dh] = ctx_h.astype(bf16)

    attn = jnp.dot(ctx_ref[...], out_w_ref[...],
                   preferred_element_type=f32) + out_b_ref[...]
    x = x + attn

    # ---------------- MLP branch ----------------
    h2 = _layernorm(x, ln2_w_ref[...], ln2_b_ref[...])
    hfc = jnp.dot(h2.astype(bf16), fc_w_ref[...],
                  preferred_element_type=f32) + fc_b_ref[...]  # (L, 4W) f32
    hfc = hfc * jax.nn.sigmoid(1.702 * hfc)                    # QuickGELU, f32
    hpr = jnp.dot(hfc.astype(bf16), proj_w_ref[...],
                  preferred_element_type=f32) + proj_b_ref[...]
    o_ref[0] = (x + hpr).astype(o_ref.dtype)


def _vmem_capacity_cap():
    """Per-generation VMEM cap: physical capacity minus headroom."""
    try:
        info = pltpu.get_tpu_info()
        capacity = getattr(info, "vmem_capacity_bytes", None)
        if capacity:
            return max(int(capacity) - (8 << 20), 16 << 20)
    except Exception:
        pass
    # Conservative fallback that still fits v7x's 64 MiB physical VMEM.
    return 56 << 20


def _vmem_limit_bytes(L, W, heads, weight_buffers, x_bytes):
    """Rough per-pallas_call VMEM budget (weights + activations + headroom)."""
    del heads
    tq = min(L, 256)
    weight_bytes = weight_buffers * (2 * 12 * W * W + 4 * 16 * W)
    act_bytes = (x_bytes * 4 * L * W            # x slab in/out, double buffered
                 + 4 * (3 * L * W)              # qkv f32 before scratch store
                 + 4 * (4 * L * W)              # hfc
                 + 4 * (3 * tq * L)             # one head's score/prob tiles
                 + 4 * (2 * L * W)              # misc temporaries
                 + 2 * (4 * L * W))             # bf16 qkv + ctx scratch
    est = weight_bytes + act_bytes + (8 << 20)
    return int(min(max(est, 32 << 20), _vmem_capacity_cap()))


def _const_spec(shape, single_buffer):
    """BlockSpec for a weight/bias whose block never changes across the grid."""
    index_map = lambda n, _nd=len(shape): (0,) * _nd
    if single_buffer:
        try:
            return pl.BlockSpec(shape, index_map, pipeline_mode=pl.Buffered(1))
        except Exception:
            pass   # older builds: fall back to default buffering
    return pl.BlockSpec(shape, index_map)


def residual_attention_block(x, layer_params, heads, single_buffer_weights=True):
    """x: (N, L, W).  layer_params: tuple of 12 kernel-ready arrays."""
    N, L, W = x.shape
    assert W % heads == 0
    q_tile = min(L, 256)
    kernel = functools.partial(resblock_kernel, heads=heads, q_tile=q_tile)

    in_specs = [pl.BlockSpec((1, L, W), lambda n: (n, 0, 0))]         # x
    in_specs += [_const_spec(a.shape, single_buffer_weights) for a in layer_params]

    vmem_limit = _vmem_limit_bytes(L, W, heads,
                                   1 if single_buffer_weights else 2,
                                   x.dtype.itemsize)

    return pl.pallas_call(
        kernel,
        out_shape=jax.ShapeDtypeStruct((N, L, W), x.dtype),
        grid=(N,),
        in_specs=in_specs,
        out_specs=pl.BlockSpec((1, L, W), lambda n: (n, 0, 0)),
        scratch_shapes=[pltpu.VMEM((L, 3 * W), jnp.bfloat16),   # staged QKV
                        pltpu.VMEM((L, W), jnp.bfloat16)],      # per-head ctx
        compiler_params=pltpu.CompilerParams(
            dimension_semantics=("parallel",),
            vmem_limit_bytes=vmem_limit),
    )(x, *layer_params)


def init_transformer_params(key, width, layers):
    """Deterministic init mirroring the PyTorch module's __init__ scaling.

    Stored in the PyTorch layout: in_proj_weight (3W, W), out_proj.weight (W, W),
    c_fc.weight (4W, W), c_proj.weight (W, 4W); biases as (1, dim).
    """
    proj_std = width ** (-0.5) * (2 * layers) ** (-0.5)
    attn_std = width ** (-0.5)
    fc_std = (2 * width) ** (-0.5)

    params = []
    for _ in range(layers):
        key, k1, k2, k3, k4 = jax.random.split(key, 5)
        p = (
            jnp.ones((1, width), jnp.float32),                                   # ln1 w
            jnp.zeros((1, width), jnp.float32),                                  # ln1 b
            attn_std * jax.random.normal(k1, (3 * width, width), jnp.float32),   # in_proj w
            jnp.zeros((1, 3 * width), jnp.float32),                              # in_proj b
            proj_std * jax.random.normal(k2, (width, width), jnp.float32),       # out_proj w
            jnp.zeros((1, width), jnp.float32),                                  # out_proj b
            jnp.ones((1, width), jnp.float32),                                   # ln2 w
            jnp.zeros((1, width), jnp.float32),                                  # ln2 b
            fc_std * jax.random.normal(k3, (4 * width, width), jnp.float32),     # c_fc w
            jnp.zeros((1, 4 * width), jnp.float32),                              # c_fc b
            proj_std * jax.random.normal(k4, (width, 4 * width), jnp.float32),   # c_proj w
            jnp.zeros((1, width), jnp.float32),                                  # c_proj b
        )
        params.append(p)
    return params


def prepare_layer_params(p, heads):
    """Convert PyTorch-layout f32 params to the kernel layout:
       pre-transposed bf16 weight matrices, 1/sqrt(dh) folded into Q proj."""
    (ln1_w, ln1_b, in_w, in_b, out_w, out_b,
     ln2_w, ln2_b, fc_w, fc_b, proj_w, proj_b) = p
    W = ln1_w.shape[-1]
    dh = W // heads
    scale = 1.0 / float(dh) ** 0.5

    # Fold attention scale into the Q rows of in_proj weight and bias.
    q_scale = jnp.concatenate(
        [jnp.full((W,), scale, jnp.float32), jnp.ones((2 * W,), jnp.float32)])
    in_w_t = (in_w * q_scale[:, None]).T.astype(jnp.bfloat16)     # (W, 3W)
    in_b_s = (in_b * q_scale[None, :]).astype(jnp.float32)        # (1, 3W)

    out_w_t = out_w.T.astype(jnp.bfloat16)                        # (W, W)
    fc_w_t = fc_w.T.astype(jnp.bfloat16)                          # (W, 4W)
    proj_w_t = proj_w.T.astype(jnp.bfloat16)                      # (4W, W)

    return (ln1_w, ln1_b, in_w_t, in_b_s, out_w_t, out_b,
            ln2_w, ln2_b, fc_w_t, fc_b, proj_w_t, proj_b)


@functools.partial(jax.jit,
                   static_argnames=("heads", "single_buffer_weights",
                                    "bf16_activations"))
def transformer_forward(x_lnd, params, heads, single_buffer_weights=True,
                        bf16_activations=False):
    """x_lnd: (L, N, W) — same layout PyTorch's forward receives."""
    in_dtype = x_lnd.dtype
    x = jnp.transpose(x_lnd, (1, 0, 2))          # (N, L, W) for the kernel
    if bf16_activations:
        # Halves the per-layer activation HBM round trip (mainly a v5e win);
        # residual add / LN math stays f32 inside the kernel.
        x = x.astype(jnp.bfloat16)
    for layer_params in params:
        x = residual_attention_block(x, layer_params, heads, single_buffer_weights)
    return jnp.transpose(x, (1, 0, 2)).astype(in_dtype)   # back to (L, N, W)


if __name__ == "__main__":
    width, layers, heads = 32, 2, 4
    seq, batch = 8, 2

    key = jax.random.PRNGKey(0)
    key, kx = jax.random.split(key)
    x = jax.random.normal(kx, (seq, batch, width), jnp.float32)   # (L, N, W)

    torch_layout_params = init_transformer_params(key, width, layers)
    params = [prepare_layer_params(p, heads) for p in torch_layout_params]

    try:
        out = transformer_forward(x, params, heads=heads,
                                  single_buffer_weights=True)
        out = jax.block_until_ready(out)
    except Exception:
        # Fallback for JAX builds where pipeline_mode=pl.Buffered(1) is not
        # supported on a top-level pallas_call BlockSpec.
        out = transformer_forward(x, params, heads=heads,
                                  single_buffer_weights=False)
        out = jax.block_until_ready(out)

    assert out.shape == (seq, batch, width)
    assert bool(jnp.all(jnp.isfinite(out)))
    print("KERNEL_OK")
</pallas_src>

<mosaic_0001>
module attributes {stable_mosaic.version = 11 : i64} {
  func.func @resblock_kernel(%arg0: i32, %arg1: memref<1x8x32xf32, #tpu.memory_space<vmem>>, %arg2: memref<1x32xf32, #tpu.memory_space<vmem>>, %arg3: memref<1x32xf32, #tpu.memory_space<vmem>>, %arg4: memref<32x96xbf16, #tpu.memory_space<vmem>>, %arg5: memref<1x96xf32, #tpu.memory_space<vmem>>, %arg6: memref<32x32xbf16, #tpu.memory_space<vmem>>, %arg7: memref<1x32xf32, #tpu.memory_space<vmem>>, %arg8: memref<1x32xf32, #tpu.memory_space<vmem>>, %arg9: memref<1x32xf32, #tpu.memory_space<vmem>>, %arg10: memref<32x128xbf16, #tpu.memory_space<vmem>>, %arg11: memref<1x128xf32, #tpu.memory_space<vmem>>, %arg12: memref<128x32xbf16, #tpu.memory_space<vmem>>, %arg13: memref<1x32xf32, #tpu.memory_space<vmem>>, %arg14: memref<1x8x32xf32, #tpu.memory_space<vmem>>, %arg15: memref<8x96xbf16, #tpu.memory_space<vmem>>, %arg16: memref<8x32xbf16, #tpu.memory_space<vmem>>) attributes {dimension_semantics = [#tpu.dimension_semantics<parallel>], iteration_bounds = array<i64: 2>, scalar_prefetch = 0 : i64, scratch_operands = 2 : i64, tpu.core_type = #tpu.core_type<tc>, window_params = [{transform_indices = @transform_0, window_bounds = array<i64: 1, 8, 32>}, {pipeline_mode = #tpu.pipeline_mode<synchronous>, transform_indices = @transform_1, window_bounds = array<i64: 1, 32>}, {pipeline_mode = #tpu.pipeline_mode<synchronous>, transform_indices = @transform_2, window_bounds = array<i64: 1, 32>}, {pipeline_mode = #tpu.pipeline_mode<synchronous>, transform_indices = @transform_3, window_bounds = array<i64: 32, 96>}, {pipeline_mode = #tpu.pipeline_mode<synchronous>, transform_indices = @transform_4, window_bounds = array<i64: 1, 96>}, {pipeline_mode = #tpu.pipeline_mode<synchronous>, transform_indices = @transform_5, window_bounds = array<i64: 32, 32>}, {pipeline_mode = #tpu.pipeline_mode<synchronous>, transform_indices = @transform_6, window_bounds = array<i64: 1, 32>}, {pipeline_mode = #tpu.pipeline_mode<synchronous>, transform_indices = @transform_7, window_bounds = array<i64: 1, 32>}, {pipeline_mode = #tpu.pipeline_mode<synchronous>, transform_indices = @transform_8, window_bounds = array<i64: 1, 32>}, {pipeline_mode = #tpu.pipeline_mode<synchronous>, transform_indices = @transform_9, window_bounds = array<i64: 32, 128>}, {pipeline_mode = #tpu.pipeline_mode<synchronous>, transform_indices = @transform_10, window_bounds = array<i64: 1, 128>}, {pipeline_mode = #tpu.pipeline_mode<synchronous>, transform_indices = @transform_11, window_bounds = array<i64: 128, 32>}, {pipeline_mode = #tpu.pipeline_mode<synchronous>, transform_indices = @transform_12, window_bounds = array<i64: 1, 32>}, {transform_indices = @transform_13, window_bounds = array<i64: 1, 8, 32>}]} {
    %c0 = arith.constant 0 : index
    %c0_0 = arith.constant 0 : index
    %c0_1 = arith.constant 0 : index
    %0 = vector.load %arg1[%c0, %c0_0, %c0_1] : memref<1x8x32xf32, #tpu.memory_space<vmem>>, vector<1x8x32xf32>
    %1 = vector.shape_cast %0 : vector<1x8x32xf32> to vector<8x32xf32>
    %c0_2 = arith.constant 0 : index
    %c0_3 = arith.constant 0 : index
    %2 = vector.load %arg2[%c0_2, %c0_3] : memref<1x32xf32, #tpu.memory_space<vmem>>, vector<1x32xf32>
    %c0_4 = arith.constant 0 : index
    %c0_5 = arith.constant 0 : index
    %3 = vector.load %arg3[%c0_4, %c0_5] : memref<1x32xf32, #tpu.memory_space<vmem>>, vector<1x32xf32>
    %cst = arith.constant dense<0.000000e+00> : vector<8xf32>
    %4 = vector.multi_reduction <add>, %1, %cst [1] : vector<8x32xf32> to vector<8xf32>
    %5 = vector.shape_cast %4 : vector<8xf32> to vector<8x1xf32>
    %cst_6 = arith.constant 3.200000e+01 : f32
    %6 = vector.broadcast %cst_6 : f32 to vector<8x1xf32>
    %7 = arith.divf %5, %6 : vector<8x1xf32>
    %8 = vector.broadcast %7 : vector<8x1xf32> to vector<8x32xf32>
    %9 = arith.subf %1, %8 : vector<8x32xf32>
    %10 = arith.mulf %9, %9 : vector<8x32xf32>
    %cst_7 = arith.constant dense<0.000000e+00> : vector<8xf32>
    %11 = vector.multi_reduction <add>, %10, %cst_7 [1] : vector<8x32xf32> to vector<8xf32>
    %12 = vector.shape_cast %11 : vector<8xf32> to vector<8x1xf32>
    %cst_8 = arith.constant 3.200000e+01 : f32
    %13 = vector.broadcast %cst_8 : f32 to vector<8x1xf32>
    %14 = arith.divf %12, %13 : vector<8x1xf32>
    %cst_9 = arith.constant 9.99999974E-6 : f32
    %15 = vector.broadcast %cst_9 : f32 to vector<8x1xf32>
    %16 = arith.addf %14, %15 : vector<8x1xf32>
    %17 = math.rsqrt %16 : vector<8x1xf32>
    %18 = vector.broadcast %17 : vector<8x1xf32> to vector<8x32xf32>
    %19 = arith.mulf %9, %18 : vector<8x32xf32>
    %20 = vector.broadcast %2 : vector<1x32xf32> to vector<8x32xf32>
    %21 = arith.mulf %19, %20 : vector<8x32xf32>
    %22 = vector.broadcast %3 : vector<1x32xf32> to vector<8x32xf32>
    %23 = arith.addf %21, %22 : vector<8x32xf32>
    %24 = arith.truncf %23 : vector<8x32xf32> to vector<8x32xbf16>
    %c0_10 = arith.constant 0 : index
    %c0_11 = arith.constant 0 : index
    %25 = vector.load %arg4[%c0_10, %c0_11] : memref<32x96xbf16, #tpu.memory_space<vmem>>, vector<32x96xbf16>
    %cst_12 = arith.constant dense<0.000000e+00> : vector<8x96xf32>
    %26 = tpu.matmul %24, %25, %cst_12 {dimension_numbers = #tpu.dot_dimension_numbers<[1], [0], [0], [1], [0, 0, 1, 1], [], []>} : vector<8x32xbf16>, vector<32x96xbf16>, vector<8x96xf32> -> vector<8x96xf32>
    %c0_13 = arith.constant 0 : index
    %c0_14 = arith.constant 0 : index
    %27 = vector.load %arg5[%c0_13, %c0_14] : memref<1x96xf32, #tpu.memory_space<vmem>>, vector<1x96xf32>
    %28 = vector.broadcast %27 : vector<1x96xf32> to vector<8x96xf32>
    %29 = arith.addf %26, %28 : vector<8x96xf32>
    %30 = arith.truncf %29 : vector<8x96xf32> to vector<8x96xbf16>
    %c0_15 = arith.constant 0 : index
    %c0_16 = arith.constant 0 : index
    %31 = vector.load %arg15[%c0_15, %c0_16] : memref<8x96xbf16, #tpu.memory_space<vmem>>, vector<8x96xbf16>
    tpu.vector_store %arg15[%c0_15, %c0_16], %30 {strides = array<i32>} : memref<8x96xbf16, #tpu.memory_space<vmem>>, vector<8x96xbf16>,
    %c0_17 = arith.constant 0 : index
    %c32 = arith.constant 32 : index
    %32 = vector.load %arg15[%c0_17, %c32] : memref<8x96xbf16, #tpu.memory_space<vmem>>, vector<8x8xbf16>
    %c0_18 = arith.constant 0 : index
    %c64 = arith.constant 64 : index
    %33 = vector.load %arg15[%c0_18, %c64] : memref<8x96xbf16, #tpu.memory_space<vmem>>, vector<8x8xbf16>
    %c0_19 = arith.constant 0 : index
    %c0_20 = arith.constant 0 : index
    %34 = vector.load %arg15[%c0_19, %c0_20] : memref<8x96xbf16, #tpu.memory_space<vmem>>, vector<8x8xbf16>
    %cst_21 = arith.constant dense<0.000000e+00> : vector<8x8xf32>
    %35 = tpu.matmul %34, %32, %cst_21 {dimension_numbers = #tpu.dot_dimension_numbers<[1], [1], [0], [0], [0, 0, 1, 0], [], []>} : vector<8x8xbf16>, vector<8x8xbf16>, vector<8x8xf32> -> vector<8x8xf32>
    %cst_22 = arith.constant dense<0xFF800000> : vector<8xf32>
    %36 = vector.multi_reduction <maximumf>, %35, %cst_22 [1] : vector<8x8xf32> to vector<8xf32>
    %37 = vector.shape_cast %36 : vector<8xf32> to vector<8x1xf32>
    %38 = vector.broadcast %37 : vector<8x1xf32> to vector<8x8xf32>
    %39 = arith.subf %35, %38 : vector<8x8xf32>
    %40 = math.exp %39 : vector<8x8xf32>
    %cst_23 = arith.constant dense<0.000000e+00> : vector<8xf32>
    %41 = vector.multi_reduction <add>, %40, %cst_23 [1] : vector<8x8xf32> to vector<8xf32>
    %42 = vector.shape_cast %41 : vector<8xf32> to vector<8x1xf32>
    %43 = tpu.reciprocal %42 {approx = true} : vector<8x1xf32> -> vector<8x1xf32>
    %44 = vector.broadcast %43 : vector<8x1xf32> to vector<8x8xf32>
    %45 = arith.mulf %40, %44 : vector<8x8xf32>
    %46 = arith.truncf %45 : vector<8x8xf32> to vector<8x8xbf16>
    %cst_24 = arith.constant dense<0.000000e+00> : vector<8x8xf32>
    %47 = tpu.matmul %46, %33, %cst_24 {dimension_numbers = #tpu.dot_dimension_numbers<[1], [0], [0], [1], [0, 0, 1, 1], [], []>} : vector<8x8xbf16>, vector<8x8xbf16>, vector<8x8xf32> -> vector<8x8xf32>
    %48 = arith.truncf %47 : vector<8x8xf32> to vector<8x8xbf16>
    %c0_25 = arith.constant 0 : index
    %c0_26 = arith.constant 0 : index
    %49 = vector.load %arg16[%c0_25, %c0_26] : memref<8x32xbf16, #tpu.memory_space<vmem>>, vector<8x8xbf16>
    tpu.vector_store %arg16[%c0_25, %c0_26], %48 {strides = array<i32>} : memref<8x32xbf16, #tpu.memory_space<vmem>>, vector<8x8xbf16>,
    %c0_27 = arith.constant 0 : index
    %c40 = arith.constant 40 : index
    %50 = vector.load %arg15[%c0_27, %c40] : memref<8x96xbf16, #tpu.memory_space<vmem>>, vector<8x8xbf16>
    %c0_28 = arith.constant 0 : index
    %c72 = arith.constant 72 : index
    %51 = vector.load %arg15[%c0_28, %c72] : memref<8x96xbf16, #tpu.memory_space<vmem>>, vector<8x8xbf16>
    %c0_29 = arith.constant 0 : index
    %c8 = arith.constant 8 : index
    %52 = vector.load %arg15[%c0_29, %c8] : memref<8x96xbf16, #tpu.memory_space<vmem>>, vector<8x8xbf16>
    %cst_30 = arith.constant dense<0.000000e+00> : vector<8x8xf32>
    %53 = tpu.matmul %52, %50, %cst_30 {dimension_numbers = #tpu.dot_dimension_numbers<[1], [1], [0], [0], [0, 0, 1, 0], [], []>} : vector<8x8xbf16>, vector<8x8xbf16>, vector<8x8xf32> -> vector<8x8xf32>
    %cst_31 = arith.constant dense<0xFF800000> : vector<8xf32>
    %54 = vector.multi_reduction <maximumf>, %53, %cst_31 [1] : vector<8x8xf32> to vector<8xf32>
    %55 = vector.shape_cast %54 : vector<8xf32> to vector<8x1xf32>
    %56 = vector.broadcast %55 : vector<8x1xf32> to vector<8x8xf32>
    %57 = arith.subf %53, %56 : vector<8x8xf32>
    %58 = math.exp %57 : vector<8x8xf32>
    %cst_32 = arith.constant dense<0.000000e+00> : vector<8xf32>
    %59 = vector.multi_reduction <add>, %58, %cst_32 [1] : vector<8x8xf32> to vector<8xf32>
    %60 = vector.shape_cast %59 : vector<8xf32> to vector<8x1xf32>
    %61 = tpu.reciprocal %60 {approx = true} : vector<8x1xf32> -> vector<8x1xf32>
    %62 = vector.broadcast %61 : vector<8x1xf32> to vector<8x8xf32>
    %63 = arith.mulf %58, %62 : vector<8x8xf32>
    %64 = arith.truncf %63 : vector<8x8xf32> to vector<8x8xbf16>
    %cst_33 = arith.constant dense<0.000000e+00> : vector<8x8xf32>
    %65 = tpu.matmul %64, %51, %cst_33 {dimension_numbers = #tpu.dot_dimension_numbers<[1], [0], [0], [1], [0, 0, 1, 1], [], []>} : vector<8x8xbf16>, vector<8x8xbf16>, vector<8x8xf32> -> vector<8x8xf32>
    %66 = arith.truncf %65 : vector<8x8xf32> to vector<8x8xbf16>
    %c0_34 = arith.constant 0 : index
    %c8_35 = arith.constant 8 : index
    %67 = vector.load %arg16[%c0_34, %c8_35] : memref<8x32xbf16, #tpu.memory_space<vmem>>, vector<8x8xbf16>
    tpu.vector_store %arg16[%c0_34, %c8_35], %66 {strides = array<i32>} : memref<8x32xbf16, #tpu.memory_space<vmem>>, vector<8x8xbf16>,
    %c0_36 = arith.constant 0 : index
    %c48 = arith.constant 48 : index
    %68 = vector.load %arg15[%c0_36, %c48] : memref<8x96xbf16, #tpu.memory_space<vmem>>, vector<8x8xbf16>
    %c0_37 = arith.constant 0 : index
    %c80 = arith.constant 80 : index
    %69 = vector.load %arg15[%c0_37, %c80] : memref<8x96xbf16, #tpu.memory_space<vmem>>, vector<8x8xbf16>
    %c0_38 = arith.constant 0 : index
    %c16 = arith.constant 16 : index
    %70 = vector.load %arg15[%c0_38, %c16] : memref<8x96xbf16, #tpu.memory_space<vmem>>, vector<8x8xbf16>
    %cst_39 = arith.constant dense<0.000000e+00> : vector<8x8xf32>
    %71 = tpu.matmul %70, %68, %cst_39 {dimension_numbers = #tpu.dot_dimension_numbers<[1], [1], [0], [0], [0, 0, 1, 0], [], []>} : vector<8x8xbf16>, vector<8x8xbf16>, vector<8x8xf32> -> vector<8x8xf32>
    %cst_40 = arith.constant dense<0xFF800000> : vector<8xf32>
    %72 = vector.multi_reduction <maximumf>, %71, %cst_40 [1] : vector<8x8xf32> to vector<8xf32>
    %73 = vector.shape_cast %72 : vector<8xf32> to vector<8x1xf32>
    %74 = vector.broadcast %73 : vector<8x1xf32> to vector<8x8xf32>
    %75 = arith.subf %71, %74 : vector<8x8xf32>
    %76 = math.exp %75 : vector<8x8xf32>
    %cst_41 = arith.constant dense<0.000000e+00> : vector<8xf32>
    %77 = vector.multi_reduction <add>, %76, %cst_41 [1] : vector<8x8xf32> to vector<8xf32>
    %78 = vector.shape_cast %77 : vector<8xf32> to vector<8x1xf32>
    %79 = tpu.reciprocal %78 {approx = true} : vector<8x1xf32> -> vector<8x1xf32>
    %80 = vector.broadcast %79 : vector<8x1xf32> to vector<8x8xf32>
    %81 = arith.mulf %76, %80 : vector<8x8xf32>
    %82 = arith.truncf %81 : vector<8x8xf32> to vector<8x8xbf16>
    %cst_42 = arith.constant dense<0.000000e+00> : vector<8x8xf32>
    %83 = tpu.matmul %82, %69, %cst_42 {dimension_numbers = #tpu.dot_dimension_numbers<[1], [0], [0], [1], [0, 0, 1, 1], [], []>} : vector<8x8xbf16>, vector<8x8xbf16>, vector<8x8xf32> -> vector<8x8xf32>
    %84 = arith.truncf %83 : vector<8x8xf32> to vector<8x8xbf16>
    %c0_43 = arith.constant 0 : index
    %c16_44 = arith.constant 16 : index
    %85 = vector.load %arg16[%c0_43, %c16_44] : memref<8x32xbf16, #tpu.memory_space<vmem>>, vector<8x8xbf16>
    tpu.vector_store %arg16[%c0_43, %c16_44], %84 {strides = array<i32>} : memref<8x32xbf16, #tpu.memory_space<vmem>>, vector<8x8xbf16>,
    %c0_45 = arith.constant 0 : index
    %c56 = arith.constant 56 : index
    %86 = vector.load %arg15[%c0_45, %c56] : memref<8x96xbf16, #tpu.memory_space<vmem>>, vector<8x8xbf16>
    %c0_46 = arith.constant 0 : index
    %c88 = arith.constant 88 : index
    %87 = vector.load %arg15[%c0_46, %c88] : memref<8x96xbf16, #tpu.memory_space<vmem>>, vector<8x8xbf16>
    %c0_47 = arith.constant 0 : index
    %c24 = arith.constant 24 : index
    %88 = vector.load %arg15[%c0_47, %c24] : memref<8x96xbf16, #tpu.memory_space<vmem>>, vector<8x8xbf16>
    %cst_48 = arith.constant dense<0.000000e+00> : vector<8x8xf32>
    %89 = tpu.matmul %88, %86, %cst_48 {dimension_numbers = #tpu.dot_dimension_numbers<[1], [1], [0], [0], [0, 0, 1, 0], [], []>} : vector<8x8xbf16>, vector<8x8xbf16>, vector<8x8xf32> -> vector<8x8xf32>
    %cst_49 = arith.constant dense<0xFF800000> : vector<8xf32>
    %90 = vector.multi_reduction <maximumf>, %89, %cst_49 [1] : vector<8x8xf32> to vector<8xf32>
    %91 = vector.shape_cast %90 : vector<8xf32> to vector<8x1xf32>
    %92 = vector.broadcast %91 : vector<8x1xf32> to vector<8x8xf32>
    %93 = arith.subf %89, %92 : vector<8x8xf32>
    %94 = math.exp %93 : vector<8x8xf32>
    %cst_50 = arith.constant dense<0.000000e+00> : vector<8xf32>
    %95 = vector.multi_reduction <add>, %94, %cst_50 [1] : vector<8x8xf32> to vector<8xf32>
    %96 = vector.shape_cast %95 : vector<8xf32> to vector<8x1xf32>
    %97 = tpu.reciprocal %96 {approx = true} : vector<8x1xf32> -> vector<8x1xf32>
    %98 = vector.broadcast %97 : vector<8x1xf32> to vector<8x8xf32>
    %99 = arith.mulf %94, %98 : vector<8x8xf32>
    %100 = arith.truncf %99 : vector<8x8xf32> to vector<8x8xbf16>
    %cst_51 = arith.constant dense<0.000000e+00> : vector<8x8xf32>
    %101 = tpu.matmul %100, %87, %cst_51 {dimension_numbers = #tpu.dot_dimension_numbers<[1], [0], [0], [1], [0, 0, 1, 1], [], []>} : vector<8x8xbf16>, vector<8x8xbf16>, vector<8x8xf32> -> vector<8x8xf32>
    %102 = arith.truncf %101 : vector<8x8xf32> to vector<8x8xbf16>
    %c0_52 = arith.constant 0 : index
    %c24_53 = arith.constant 24 : index
    %103 = vector.load %arg16[%c0_52, %c24_53] : memref<8x32xbf16, #tpu.memory_space<vmem>>, vector<8x8xbf16>
    tpu.vector_store %arg16[%c0_52, %c24_53], %102 {strides = array<i32>} : memref<8x32xbf16, #tpu.memory_space<vmem>>, vector<8x8xbf16>,
    %c0_54 = arith.constant 0 : index
    %c0_55 = arith.constant 0 : index
    %104 = vector.load %arg16[%c0_54, %c0_55] : memref<8x32xbf16, #tpu.memory_space<vmem>>, vector<8x32xbf16>
    %c0_56 = arith.constant 0 : index
    %c0_57 = arith.constant 0 : index
    %105 = vector.load %arg6[%c0_56, %c0_57] : memref<32x32xbf16, #tpu.memory_space<vmem>>, vector<32x32xbf16>
    %cst_58 = arith.constant dense<0.000000e+00> : vector<8x32xf32>
    %106 = tpu.matmul %104, %105, %cst_58 {dimension_numbers = #tpu.dot_dimension_numbers<[1], [0], [0], [1], [0, 0, 1, 1], [], []>} : vector<8x32xbf16>, vector<32x32xbf16>, vector<8x32xf32> -> vector<8x32xf32>
    %c0_59 = arith.constant 0 : index
    %c0_60 = arith.constant 0 : index
    %107 = vector.load %arg7[%c0_59, %c0_60] : memref<1x32xf32, #tpu.memory_space<vmem>>, vector<1x32xf32>
    %108 = vector.broadcast %107 : vector<1x32xf32> to vector<8x32xf32>
    %109 = arith.addf %106, %108 : vector<8x32xf32>
    %110 = arith.addf %1, %109 : vector<8x32xf32>
    %c0_61 = arith.constant 0 : index
    %c0_62 = arith.constant 0 : index
    %111 = vector.load %arg8[%c0_61, %c0_62] : memref<1x32xf32, #tpu.memory_space<vmem>>, vector<1x32xf32>
    %c0_63 = arith.constant 0 : index
    %c0_64 = arith.constant 0 : index
    %112 = vector.load %arg9[%c0_63, %c0_64] : memref<1x32xf32, #tpu.memory_space<vmem>>, vector<1x32xf32>
    %cst_65 = arith.constant dense<0.000000e+00> : vector<8xf32>
    %113 = vector.multi_reduction <add>, %110, %cst_65 [1] : vector<8x32xf32> to vector<8xf32>
    %114 = vector.shape_cast %113 : vector<8xf32> to vector<8x1xf32>
    %cst_66 = arith.constant 3.200000e+01 : f32
    %115 = vector.broadcast %cst_66 : f32 to vector<8x1xf32>
    %116 = arith.divf %114, %115 : vector<8x1xf32>
    %117 = vector.broadcast %116 : vector<8x1xf32> to vector<8x32xf32>
    %118 = arith.subf %110, %117 : vector<8x32xf32>
    %119 = arith.mulf %118, %118 : vector<8x32xf32>
    %cst_67 = arith.constant dense<0.000000e+00> : vector<8xf32>
    %120 = vector.multi_reduction <add>, %119, %cst_67 [1] : vector<8x32xf32> to vector<8xf32>
    %121 = vector.shape_cast %120 : vector<8xf32> to vector<8x1xf32>
    %cst_68 = arith.constant 3.200000e+01 : f32
    %122 = vector.broadcast %cst_68 : f32 to vector<8x1xf32>
    %123 = arith.divf %121, %122 : vector<8x1xf32>
    %cst_69 = arith.constant 9.99999974E-6 : f32
    %124 = vector.broadcast %cst_69 : f32 to vector<8x1xf32>
    %125 = arith.addf %123, %124 : vector<8x1xf32>
    %126 = math.rsqrt %125 : vector<8x1xf32>
    %127 = vector.broadcast %126 : vector<8x1xf32> to vector<8x32xf32>
    %128 = arith.mulf %118, %127 : vector<8x32xf32>
    %129 = vector.broadcast %111 : vector<1x32xf32> to vector<8x32xf32>
    %130 = arith.mulf %128, %129 : vector<8x32xf32>
    %131 = vector.broadcast %112 : vector<1x32xf32> to vector<8x32xf32>
    %132 = arith.addf %130, %131 : vector<8x32xf32>
    %133 = arith.truncf %132 : vector<8x32xf32> to vector<8x32xbf16>
    %c0_70 = arith.constant 0 : index
    %c0_71 = arith.constant 0 : index
    %134 = vector.load %arg10[%c0_70, %c0_71] : memref<32x128xbf16, #tpu.memory_space<vmem>>, vector<32x128xbf16>
    %cst_72 = arith.constant dense<0.000000e+00> : vector<8x128xf32>
    %135 = tpu.matmul %133, %134, %cst_72 {dimension_numbers = #tpu.dot_dimension_numbers<[1], [0], [0], [1], [0, 0, 1, 1], [], []>} : vector<8x32xbf16>, vector<32x128xbf16>, vector<8x128xf32> -> vector<8x128xf32>
    %c0_73 = arith.constant 0 : index
    %c0_74 = arith.constant 0 : index
    %136 = vector.load %arg11[%c0_73, %c0_74] : memref<1x128xf32, #tpu.memory_space<vmem>>, vector<1x128xf32>
    %137 = vector.broadcast %136 : vector<1x128xf32> to vector<8x128xf32>
    %138 = arith.addf %135, %137 : vector<8x128xf32>
    %cst_75 = arith.constant 1.702000e+00 : f32
    %139 = vector.broadcast %cst_75 : f32 to vector<8x128xf32>
    %140 = arith.mulf %139, %138 : vector<8x128xf32>
    %141 = arith.negf %140 : vector<8x128xf32>
    %142 = math.exp %141 : vector<8x128xf32>
    %cst_76 = arith.constant 1.000000e+00 : f32
    %143 = vector.broadcast %cst_76 : f32 to vector<8x128xf32>
    %144 = arith.addf %143, %142 : vector<8x128xf32>
    %145 = arith.divf %143, %144 : vector<8x128xf32>
    %146 = arith.mulf %138, %145 : vector<8x128xf32>
    %147 = arith.truncf %146 : vector<8x128xf32> to vector<8x128xbf16>
    %c0_77 = arith.constant 0 : index
    %c0_78 = arith.constant 0 : index
    %148 = vector.load %arg12[%c0_77, %c0_78] : memref<128x32xbf16, #tpu.memory_space<vmem>>, vector<128x32xbf16>
    %cst_79 = arith.constant dense<0.000000e+00> : vector<8x32xf32>
    %149 = tpu.matmul %147, %148, %cst_79 {dimension_numbers = #tpu.dot_dimension_numbers<[1], [0], [0], [1], [0, 0, 1, 1], [], []>} : vector<8x128xbf16>, vector<128x32xbf16>, vector<8x32xf32> -> vector<8x32xf32>
    %c0_80 = arith.constant 0 : index
    %c0_81 = arith.constant 0 : index
    %150 = vector.load %arg13[%c0_80, %c0_81] : memref<1x32xf32, #tpu.memory_space<vmem>>, vector<1x32xf32>
    %151 = vector.broadcast %150 : vector<1x32xf32> to vector<8x32xf32>
    %152 = arith.addf %149, %151 : vector<8x32xf32>
    %153 = arith.addf %110, %152 : vector<8x32xf32>
    %c0_82 = arith.constant 0 : index
    %c0_83 = arith.constant 0 : index
    %c0_84 = arith.constant 0 : index
    %154 = vector.load %arg14[%c0_82, %c0_83, %c0_84] : memref<1x8x32xf32, #tpu.memory_space<vmem>>, vector<1x8x32xf32>
    %155 = vector.shape_cast %154 : vector<1x8x32xf32> to vector<8x32xf32>
    %156 = vector.shape_cast %153 : vector<8x32xf32> to vector<1x8x32xf32>
    tpu.vector_store %arg14[%c0_82, %c0_83, %c0_84], %156 {strides = array<i32>} : memref<1x8x32xf32, #tpu.memory_space<vmem>>, vector<1x8x32xf32>,
    return
  }
  func.func @transform_0(%arg0: i32) -> (i32, i32, i32) {
    %c0_i32 = arith.constant 0 : i32
    %c0_i32_0 = arith.constant 0 : i32
    %c0_i32_1 = arith.constant 0 : i32
    return %arg0, %c0_i32, %c0_i32_0 : i32, i32, i32
  }
  func.func @transform_1(%arg0: i32) -> (i32, i32) {
    %c0_i32 = arith.constant 0 : i32
    %c0_i32_0 = arith.constant 0 : i32
    %c0_i32_1 = arith.constant 0 : i32
    return %c0_i32, %c0_i32_0 : i32, i32
  }
  func.func @transform_2(%arg0: i32) -> (i32, i32) {
    %c0_i32 = arith.constant 0 : i32
    %c0_i32_0 = arith.constant 0 : i32
    %c0_i32_1 = arith.constant 0 : i32
    return %c0_i32, %c0_i32_0 : i32, i32
  }
  func.func @transform_3(%arg0: i32) -> (i32, i32) {
    %c0_i32 = arith.constant 0 : i32
    %c0_i32_0 = arith.constant 0 : i32
    %c0_i32_1 = arith.constant 0 : i32
    return %c0_i32, %c0_i32_0 : i32, i32
  }
  func.func @transform_4(%arg0: i32) -> (i32, i32) {
    %c0_i32 = arith.constant 0 : i32
    %c0_i32_0 = arith.constant 0 : i32
    %c0_i32_1 = arith.constant 0 : i32
    return %c0_i32, %c0_i32_0 : i32, i32
  }
  func.func @transform_5(%arg0: i32) -> (i32, i32) {
    %c0_i32 = arith.constant 0 : i32
    %c0_i32_0 = arith.constant 0 : i32
    %c0_i32_1 = arith.constant 0 : i32
    return %c0_i32, %c0_i32_0 : i32, i32
  }
  func.func @transform_6(%arg0: i32) -> (i32, i32) {
    %c0_i32 = arith.constant 0 : i32
    %c0_i32_0 = arith.constant 0 : i32
    %c0_i32_1 = arith.constant 0 : i32
    return %c0_i32, %c0_i32_0 : i32, i32
  }
  func.func @transform_7(%arg0: i32) -> (i32, i32) {
    %c0_i32 = arith.constant 0 : i32
    %c0_i32_0 = arith.constant 0 : i32
    %c0_i32_1 = arith.constant 0 : i32
    return %c0_i32, %c0_i32_0 : i32, i32
  }
  func.func @transform_8(%arg0: i32) -> (i32, i32) {
    %c0_i32 = arith.constant 0 : i32
    %c0_i32_0 = arith.constant 0 : i32
    %c0_i32_1 = arith.constant 0 : i32
    return %c0_i32, %c0_i32_0 : i32, i32
  }
  func.func @transform_9(%arg0: i32) -> (i32, i32) {
    %c0_i32 = arith.constant 0 : i32
    %c0_i32_0 = arith.constant 0 : i32
    %c0_i32_1 = arith.constant 0 : i32
    return %c0_i32, %c0_i32_0 : i32, i32
  }
  func.func @transform_10(%arg0: i32) -> (i32, i32) {
    %c0_i32 = arith.constant 0 : i32
    %c0_i32_0 = arith.constant 0 : i32
    %c0_i32_1 = arith.constant 0 : i32
    return %c0_i32, %c0_i32_0 : i32, i32
  }
  func.func @transform_11(%arg0: i32) -> (i32, i32) {
    %c0_i32 = arith.constant 0 : i32
    %c0_i32_0 = arith.constant 0 : i32
    %c0_i32_1 = arith.constant 0 : i32
    return %c0_i32, %c0_i32_0 : i32, i32
  }
  func.func @transform_12(%arg0: i32) -> (i32, i32) {
    %c0_i32 = arith.constant 0 : i32
    %c0_i32_0 = arith.constant 0 : i32
    %c0_i32_1 = arith.constant 0 : i32
    return %c0_i32, %c0_i32_0 : i32, i32
  }
  func.func @transform_13(%arg0: i32) -> (i32, i32, i32) {
    %c0_i32 = arith.constant 0 : i32
    %c0_i32_0 = arith.constant 0 : i32
    %c0_i32_1 = arith.constant 0 : i32
    return %arg0, %c0_i32, %c0_i32_0 : i32, i32, i32
  }
}

module attributes {stable_mosaic.version = 11 : i64} {
  func.func @resblock_kernel(%arg0: i32, %arg1: memref<1x8x32xf32, #tpu.memory_space<vmem>>, %arg2: memref<1x32xf32, #tpu.memory_space<vmem>>, %arg3: memref<1x32xf32, #tpu.memory_space<vmem>>, %arg4: memref<32x96xbf16, #tpu.memory_space<vmem>>, %arg5: memref<1x96xf32, #tpu.memory_space<vmem>>, %arg6: memref<32x32xbf16, #tpu.memory_space<vmem>>, %arg7: memref<1x32xf32, #tpu.memory_space<vmem>>, %arg8: memref<1x32xf32, #tpu.memory_space<vmem>>, %arg9: memref<1x32xf32, #tpu.memory_space<vmem>>, %arg10: memref<32x128xbf16, #tpu.memory_space<vmem>>, %arg11: memref<1x128xf32, #tpu.memory_space<vmem>>, %arg12: memref<128x32xbf16, #tpu.memory_space<vmem>>, %arg13: memref<1x32xf32, #tpu.memory_space<vmem>>, %arg14: memref<1x8x32xf32, #tpu.memory_space<vmem>>, %arg15: memref<8x96xbf16, #tpu.memory_space<vmem>>, %arg16: memref<8x32xbf16, #tpu.memory_space<vmem>>) attributes {dimension_semantics = [#tpu.dimension_semantics<parallel>], iteration_bounds = array<i64: 2>, scalar_prefetch = 0 : i64, scratch_operands = 2 : i64, tpu.core_type = #tpu.core_type<tc>, window_params = [{transform_indices = @transform_0, window_bounds = array<i64: 1, 8, 32>}, {pipeline_mode = #tpu.pipeline_mode<synchronous>, transform_indices = @transform_1, window_bounds = array<i64: 1, 32>}, {pipeline_mode = #tpu.pipeline_mode<synchronous>, transform_indices = @transform_2, window_bounds = array<i64: 1, 32>}, {pipeline_mode = #tpu.pipeline_mode<synchronous>, transform_indices = @transform_3, window_bounds = array<i64: 32, 96>}, {pipeline_mode = #tpu.pipeline_mode<synchronous>, transform_indices = @transform_4, window_bounds = array<i64: 1, 96>}, {pipeline_mode = #tpu.pipeline_mode<synchronous>, transform_indices = @transform_5, window_bounds = array<i64: 32, 32>}, {pipeline_mode = #tpu.pipeline_mode<synchronous>, transform_indices = @transform_6, window_bounds = array<i64: 1, 32>}, {pipeline_mode = #tpu.pipeline_mode<synchronous>, transform_indices = @transform_7, window_bounds = array<i64: 1, 32>}, {pipeline_mode = #tpu.pipeline_mode<synchronous>, transform_indices = @transform_8, window_bounds = array<i64: 1, 32>}, {pipeline_mode = #tpu.pipeline_mode<synchronous>, transform_indices = @transform_9, window_bounds = array<i64: 32, 128>}, {pipeline_mode = #tpu.pipeline_mode<synchronous>, transform_indices = @transform_10, window_bounds = array<i64: 1, 128>}, {pipeline_mode = #tpu.pipeline_mode<synchronous>, transform_indices = @transform_11, window_bounds = array<i64: 128, 32>}, {pipeline_mode = #tpu.pipeline_mode<synchronous>, transform_indices = @transform_12, window_bounds = array<i64: 1, 32>}, {transform_indices = @transform_13, window_bounds = array<i64: 1, 8, 32>}]} {
    %c0 = arith.constant 0 : index
    %c0_0 = arith.constant 0 : index
    %c0_1 = arith.constant 0 : index
    %0 = vector.load %arg1[%c0, %c0_0, %c0_1] : memref<1x8x32xf32, #tpu.memory_space<vmem>>, vector<1x8x32xf32>
    %1 = vector.shape_cast %0 : vector<1x8x32xf32> to vector<8x32xf32>
    %c0_2 = arith.constant 0 : index
    %c0_3 = arith.constant 0 : index
    %2 = vector.load %arg2[%c0_2, %c0_3] : memref<1x32xf32, #tpu.memory_space<vmem>>, vector<1x32xf32>
    %c0_4 = arith.constant 0 : index
    %c0_5 = arith.constant 0 : index
    %3 = vector.load %arg3[%c0_4, %c0_5] : memref<1x32xf32, #tpu.memory_space<vmem>>, vector<1x32xf32>
    %cst = arith.constant dense<0.000000e+00> : vector<8xf32>
    %4 = vector.multi_reduction <add>, %1, %cst [1] : vector<8x32xf32> to vector<8xf32>
    %5 = vector.shape_cast %4 : vector<8xf32> to vector<8x1xf32>
    %cst_6 = arith.constant 3.200000e+01 : f32
    %6 = vector.broadcast %cst_6 : f32 to vector<8x1xf32>
    %7 = arith.divf %5, %6 : vector<8x1xf32>
    %8 = vector.broadcast %7 : vector<8x1xf32> to vector<8x32xf32>
    %9 = arith.subf %1, %8 : vector<8x32xf32>
    %10 = arith.mulf %9, %9 : vector<8x32xf32>
    %cst_7 = arith.constant dense<0.000000e+00> : vector<8xf32>
    %11 = vector.multi_reduction <add>, %10, %cst_7 [1] : vector<8x32xf32> to vector<8xf32>
    %12 = vector.shape_cast %11 : vector<8xf32> to vector<8x1xf32>
    %cst_8 = arith.constant 3.200000e+01 : f32
    %13 = vector.broadcast %cst_8 : f32 to vector<8x1xf32>
    %14 = arith.divf %12, %13 : vector<8x1xf32>
    %cst_9 = arith.constant 9.99999974E-6 : f32
    %15 = vector.broadcast %cst_9 : f32 to vector<8x1xf32>
    %16 = arith.addf %14, %15 : vector<8x1xf32>
    %17 = math.rsqrt %16 : vector<8x1xf32>
    %18 = vector.broadcast %17 : vector<8x1xf32> to vector<8x32xf32>
    %19 = arith.mulf %9, %18 : vector<8x32xf32>
    %20 = vector.broadcast %2 : vector<1x32xf32> to vector<8x32xf32>
    %21 = arith.mulf %19, %20 : vector<8x32xf32>
    %22 = vector.broadcast %3 : vector<1x32xf32> to vector<8x32xf32>
    %23 = arith.addf %21, %22 : vector<8x32xf32>
    %24 = arith.truncf %23 : vector<8x32xf32> to vector<8x32xbf16>
    %c0_10 = arith.constant 0 : index
    %c0_11 = arith.constant 0 : index
    %25 = vector.load %arg4[%c0_10, %c0_11] : memref<32x96xbf16, #tpu.memory_space<vmem>>, vector<32x96xbf16>
    %cst_12 = arith.constant dense<0.000000e+00> : vector<8x96xf32>
    %26 = tpu.matmul %24, %25, %cst_12 {dimension_numbers = #tpu.dot_dimension_numbers<[1], [0], [0], [1], [0, 0, 1, 1], [], []>} : vector<8x32xbf16>, vector<32x96xbf16>, vector<8x96xf32> -> vector<8x96xf32>
    %c0_13 = arith.constant 0 : index
    %c0_14 = arith.constant 0 : index
    %27 = vector.load %arg5[%c0_13, %c0_14] : memref<1x96xf32, #tpu.memory_space<vmem>>, vector<1x96xf32>
    %28 = vector.broadcast %27 : vector<1x96xf32> to vector<8x96xf32>
    %29 = arith.addf %26, %28 : vector<8x96xf32>
    %30 = arith.truncf %29 : vector<8x96xf32> to vector<8x96xbf16>
    %c0_15 = arith.constant 0 : index
    %c0_16 = arith.constant 0 : index
    %31 = vector.load %arg15[%c0_15, %c0_16] : memref<8x96xbf16, #tpu.memory_space<vmem>>, vector<8x96xbf16>
    tpu.vector_store %arg15[%c0_15, %c0_16], %30 {strides = array<i32>} : memref<8x96xbf16, #tpu.memory_space<vmem>>, vector<8x96xbf16>,
    %c0_17 = arith.constant 0 : index
    %c32 = arith.constant 32 : index
    %32 = vector.load %arg15[%c0_17, %c32] : memref<8x96xbf16, #tpu.memory_space<vmem>>, vector<8x8xbf16>
    %c0_18 = arith.constant 0 : index
    %c64 = arith.constant 64 : index
    %33 = vector.load %arg15[%c0_18, %c64] : memref<8x96xbf16, #tpu.memory_space<vmem>>, vector<8x8xbf16>
    %c0_19 = arith.constant 0 : index
    %c0_20 = arith.constant 0 : index
    %34 = vector.load %arg15[%c0_19, %c0_20] : memref<8x96xbf16, #tpu.memory_space<vmem>>, vector<8x8xbf16>
    %cst_21 = arith.constant dense<0.000000e+00> : vector<8x8xf32>
    %35 = tpu.matmul %34, %32, %cst_21 {dimension_numbers = #tpu.dot_dimension_numbers<[1], [1], [0], [0], [0, 0, 1, 0], [], []>} : vector<8x8xbf16>, vector<8x8xbf16>, vector<8x8xf32> -> vector<8x8xf32>
    %cst_22 = arith.constant dense<0xFF800000> : vector<8xf32>
    %36 = vector.multi_reduction <maximumf>, %35, %cst_22 [1] : vector<8x8xf32> to vector<8xf32>
    %37 = vector.shape_cast %36 : vector<8xf32> to vector<8x1xf32>
    %38 = vector.broadcast %37 : vector<8x1xf32> to vector<8x8xf32>
    %39 = arith.subf %35, %38 : vector<8x8xf32>
    %40 = math.exp %39 : vector<8x8xf32>
    %cst_23 = arith.constant dense<0.000000e+00> : vector<8xf32>
    %41 = vector.multi_reduction <add>, %40, %cst_23 [1] : vector<8x8xf32> to vector<8xf32>
    %42 = vector.shape_cast %41 : vector<8xf32> to vector<8x1xf32>
    %43 = tpu.reciprocal %42 {approx = true} : vector<8x1xf32> -> vector<8x1xf32>
    %44 = vector.broadcast %43 : vector<8x1xf32> to vector<8x8xf32>
    %45 = arith.mulf %40, %44 : vector<8x8xf32>
    %46 = arith.truncf %45 : vector<8x8xf32> to vector<8x8xbf16>
    %cst_24 = arith.constant dense<0.000000e+00> : vector<8x8xf32>
    %47 = tpu.matmul %46, %33, %cst_24 {dimension_numbers = #tpu.dot_dimension_numbers<[1], [0], [0], [1], [0, 0, 1, 1], [], []>} : vector<8x8xbf16>, vector<8x8xbf16>, vector<8x8xf32> -> vector<8x8xf32>
    %48 = arith.truncf %47 : vector<8x8xf32> to vector<8x8xbf16>
    %c0_25 = arith.constant 0 : index
    %c0_26 = arith.constant 0 : index
    %49 = vector.load %arg16[%c0_25, %c0_26] : memref<8x32xbf16, #tpu.memory_space<vmem>>, vector<8x8xbf16>
    tpu.vector_store %arg16[%c0_25, %c0_26], %48 {strides = array<i32>} : memref<8x32xbf16, #tpu.memory_space<vmem>>, vector<8x8xbf16>,
    %c0_27 = arith.constant 0 : index
    %c40 = arith.constant 40 : index
    %50 = vector.load %arg15[%c0_27, %c40] : memref<8x96xbf16, #tpu.memory_space<vmem>>, vector<8x8xbf16>
    %c0_28 = arith.constant 0 : index
    %c72 = arith.constant 72 : index
    %51 = vector.load %arg15[%c0_28, %c72] : memref<8x96xbf16, #tpu.memory_space<vmem>>, vector<8x8xbf16>
    %c0_29 = arith.constant 0 : index
    %c8 = arith.constant 8 : index
    %52 = vector.load %arg15[%c0_29, %c8] : memref<8x96xbf16, #tpu.memory_space<vmem>>, vector<8x8xbf16>
    %cst_30 = arith.constant dense<0.000000e+00> : vector<8x8xf32>
    %53 = tpu.matmul %52, %50, %cst_30 {dimension_numbers = #tpu.dot_dimension_numbers<[1], [1], [0], [0], [0, 0, 1, 0], [], []>} : vector<8x8xbf16>, vector<8x8xbf16>, vector<8x8xf32> -> vector<8x8xf32>
    %cst_31 = arith.constant dense<0xFF800000> : vector<8xf32>
    %54 = vector.multi_reduction <maximumf>, %53, %cst_31 [1] : vector<8x8xf32> to vector<8xf32>
    %55 = vector.shape_cast %54 : vector<8xf32> to vector<8x1xf32>
    %56 = vector.broadcast %55 : vector<8x1xf32> to vector<8x8xf32>
    %57 = arith.subf %53, %56 : vector<8x8xf32>
    %58 = math.exp %57 : vector<8x8xf32>
    %cst_32 = arith.constant dense<0.000000e+00> : vector<8xf32>
    %59 = vector.multi_reduction <add>, %58, %cst_32 [1] : vector<8x8xf32> to vector<8xf32>
    %60 = vector.shape_cast %59 : vector<8xf32> to vector<8x1xf32>
    %61 = tpu.reciprocal %60 {approx = true} : vector<8x1xf32> -> vector<8x1xf32>
    %62 = vector.broadcast %61 : vector<8x1xf32> to vector<8x8xf32>
    %63 = arith.mulf %58, %62 : vector<8x8xf32>
    %64 = arith.truncf %63 : vector<8x8xf32> to vector<8x8xbf16>
    %cst_33 = arith.constant dense<0.000000e+00> : vector<8x8xf32>
    %65 = tpu.matmul %64, %51, %cst_33 {dimension_numbers = #tpu.dot_dimension_numbers<[1], [0], [0], [1], [0, 0, 1, 1], [], []>} : vector<8x8xbf16>, vector<8x8xbf16>, vector<8x8xf32> -> vector<8x8xf32>
    %66 = arith.truncf %65 : vector<8x8xf32> to vector<8x8xbf16>
    %c0_34 = arith.constant 0 : index
    %c8_35 = arith.constant 8 : index
    %67 = vector.load %arg16[%c0_34, %c8_35] : memref<8x32xbf16, #tpu.memory_space<vmem>>, vector<8x8xbf16>
    tpu.vector_store %arg16[%c0_34, %c8_35], %66 {strides = array<i32>} : memref<8x32xbf16, #tpu.memory_space<vmem>>, vector<8x8xbf16>,
    %c0_36 = arith.constant 0 : index
    %c48 = arith.constant 48 : index
    %68 = vector.load %arg15[%c0_36, %c48] : memref<8x96xbf16, #tpu.memory_space<vmem>>, vector<8x8xbf16>
    %c0_37 = arith.constant 0 : index
    %c80 = arith.constant 80 : index
    %69 = vector.load %arg15[%c0_37, %c80] : memref<8x96xbf16, #tpu.memory_space<vmem>>, vector<8x8xbf16>
    %c0_38 = arith.constant 0 : index
    %c16 = arith.constant 16 : index
    %70 = vector.load %arg15[%c0_38, %c16] : memref<8x96xbf16, #tpu.memory_space<vmem>>, vector<8x8xbf16>
    %cst_39 = arith.constant dense<0.000000e+00> : vector<8x8xf32>
    %71 = tpu.matmul %70, %68, %cst_39 {dimension_numbers = #tpu.dot_dimension_numbers<[1], [1], [0], [0], [0, 0, 1, 0], [], []>} : vector<8x8xbf16>, vector<8x8xbf16>, vector<8x8xf32> -> vector<8x8xf32>
    %cst_40 = arith.constant dense<0xFF800000> : vector<8xf32>
    %72 = vector.multi_reduction <maximumf>, %71, %cst_40 [1] : vector<8x8xf32> to vector<8xf32>
    %73 = vector.shape_cast %72 : vector<8xf32> to vector<8x1xf32>
    %74 = vector.broadcast %73 : vector<8x1xf32> to vector<8x8xf32>
    %75 = arith.subf %71, %74 : vector<8x8xf32>
    %76 = math.exp %75 : vector<8x8xf32>
    %cst_41 = arith.constant dense<0.000000e+00> : vector<8xf32>
    %77 = vector.multi_reduction <add>, %76, %cst_41 [1] : vector<8x8xf32> to vector<8xf32>
    %78 = vector.shape_cast %77 : vector<8xf32> to vector<8x1xf32>
    %79 = tpu.reciprocal %78 {approx = true} : vector<8x1xf32> -> vector<8x1xf32>
    %80 = vector.broadcast %79 : vector<8x1xf32> to vector<8x8xf32>
    %81 = arith.mulf %76, %80 : vector<8x8xf32>
    %82 = arith.truncf %81 : vector<8x8xf32> to vector<8x8xbf16>
    %cst_42 = arith.constant dense<0.000000e+00> : vector<8x8xf32>
    %83 = tpu.matmul %82, %69, %cst_42 {dimension_numbers = #tpu.dot_dimension_numbers<[1], [0], [0], [1], [0, 0, 1, 1], [], []>} : vector<8x8xbf16>, vector<8x8xbf16>, vector<8x8xf32> -> vector<8x8xf32>
    %84 = arith.truncf %83 : vector<8x8xf32> to vector<8x8xbf16>
    %c0_43 = arith.constant 0 : index
    %c16_44 = arith.constant 16 : index
    %85 = vector.load %arg16[%c0_43, %c16_44] : memref<8x32xbf16, #tpu.memory_space<vmem>>, vector<8x8xbf16>
    tpu.vector_store %arg16[%c0_43, %c16_44], %84 {strides = array<i32>} : memref<8x32xbf16, #tpu.memory_space<vmem>>, vector<8x8xbf16>,
    %c0_45 = arith.constant 0 : index
    %c56 = arith.constant 56 : index
    %86 = vector.load %arg15[%c0_45, %c56] : memref<8x96xbf16, #tpu.memory_space<vmem>>, vector<8x8xbf16>
    %c0_46 = arith.constant 0 : index
    %c88 = arith.constant 88 : index
    %87 = vector.load %arg15[%c0_46, %c88] : memref<8x96xbf16, #tpu.memory_space<vmem>>, vector<8x8xbf16>
    %c0_47 = arith.constant 0 : index
    %c24 = arith.constant 24 : index
    %88 = vector.load %arg15[%c0_47, %c24] : memref<8x96xbf16, #tpu.memory_space<vmem>>, vector<8x8xbf16>
    %cst_48 = arith.constant dense<0.000000e+00> : vector<8x8xf32>
    %89 = tpu.matmul %88, %86, %cst_48 {dimension_numbers = #tpu.dot_dimension_numbers<[1], [1], [0], [0], [0, 0, 1, 0], [], []>} : vector<8x8xbf16>, vector<8x8xbf16>, vector<8x8xf32> -> vector<8x8xf32>
    %cst_49 = arith.constant dense<0xFF800000> : vector<8xf32>
    %90 = vector.multi_reduction <maximumf>, %89, %cst_49 [1] : vector<8x8xf32> to vector<8xf32>
    %91 = vector.shape_cast %90 : vector<8xf32> to vector<8x1xf32>
    %92 = vector.broadcast %91 : vector<8x1xf32> to vector<8x8xf32>
    %93 = arith.subf %89, %92 : vector<8x8xf32>
    %94 = math.exp %93 : vector<8x8xf32>
    %cst_50 = arith.constant dense<0.000000e+00> : vector<8xf32>
    %95 = vector.multi_reduction <add>, %94, %cst_50 [1] : vector<8x8xf32> to vector<8xf32>
    %96 = vector.shape_cast %95 : vector<8xf32> to vector<8x1xf32>
    %97 = tpu.reciprocal %96 {approx = true} : vector<8x1xf32> -> vector<8x1xf32>
    %98 = vector.broadcast %97 : vector<8x1xf32> to vector<8x8xf32>
    %99 = arith.mulf %94, %98 : vector<8x8xf32>
    %100 = arith.truncf %99 : vector<8x8xf32> to vector<8x8xbf16>
    %cst_51 = arith.constant dense<0.000000e+00> : vector<8x8xf32>
    %101 = tpu.matmul %100, %87, %cst_51 {dimension_numbers = #tpu.dot_dimension_numbers<[1], [0], [0], [1], [0, 0, 1, 1], [], []>} : vector<8x8xbf16>, vector<8x8xbf16>, vector<8x8xf32> -> vector<8x8xf32>
    %102 = arith.truncf %101 : vector<8x8xf32> to vector<8x8xbf16>
    %c0_52 = arith.constant 0 : index
    %c24_53 = arith.constant 24 : index
    %103 = vector.load %arg16[%c0_52, %c24_53] : memref<8x32xbf16, #tpu.memory_space<vmem>>, vector<8x8xbf16>
    tpu.vector_store %arg16[%c0_52, %c24_53], %102 {strides = array<i32>} : memref<8x32xbf16, #tpu.memory_space<vmem>>, vector<8x8xbf16>,
    %c0_54 = arith.constant 0 : index
    %c0_55 = arith.constant 0 : index
    %104 = vector.load %arg16[%c0_54, %c0_55] : memref<8x32xbf16, #tpu.memory_space<vmem>>, vector<8x32xbf16>
    %c0_56 = arith.constant 0 : index
    %c0_57 = arith.constant 0 : index
    %105 = vector.load %arg6[%c0_56, %c0_57] : memref<32x32xbf16, #tpu.memory_space<vmem>>, vector<32x32xbf16>
    %cst_58 = arith.constant dense<0.000000e+00> : vector<8x32xf32>
    %106 = tpu.matmul %104, %105, %cst_58 {dimension_numbers = #tpu.dot_dimension_numbers<[1], [0], [0], [1], [0, 0, 1, 1], [], []>} : vector<8x32xbf16>, vector<32x32xbf16>, vector<8x32xf32> -> vector<8x32xf32>
    %c0_59 = arith.constant 0 : index
    %c0_60 = arith.constant 0 : index
    %107 = vector.load %arg7[%c0_59, %c0_60] : memref<1x32xf32, #tpu.memory_space<vmem>>, vector<1x32xf32>
    %108 = vector.broadcast %107 : vector<1x32xf32> to vector<8x32xf32>
    %109 = arith.addf %106, %108 : vector<8x32xf32>
    %110 = arith.addf %1, %109 : vector<8x32xf32>
    %c0_61 = arith.constant 0 : index
    %c0_62 = arith.constant 0 : index
    %111 = vector.load %arg8[%c0_61, %c0_62] : memref<1x32xf32, #tpu.memory_space<vmem>>, vector<1x32xf32>
    %c0_63 = arith.constant 0 : index
    %c0_64 = arith.constant 0 : index
    %112 = vector.load %arg9[%c0_63, %c0_64] : memref<1x32xf32, #tpu.memory_space<vmem>>, vector<1x32xf32>
    %cst_65 = arith.constant dense<0.000000e+00> : vector<8xf32>
    %113 = vector.multi_reduction <add>, %110, %cst_65 [1] : vector<8x32xf32> to vector<8xf32>
    %114 = vector.shape_cast %113 : vector<8xf32> to vector<8x1xf32>
    %cst_66 = arith.constant 3.200000e+01 : f32
    %115 = vector.broadcast %cst_66 : f32 to vector<8x1xf32>
    %116 = arith.divf %114, %115 : vector<8x1xf32>
    %117 = vector.broadcast %116 : vector<8x1xf32> to vector<8x32xf32>
    %118 = arith.subf %110, %117 : vector<8x32xf32>
    %119 = arith.mulf %118, %118 : vector<8x32xf32>
    %cst_67 = arith.constant dense<0.000000e+00> : vector<8xf32>
    %120 = vector.multi_reduction <add>, %119, %cst_67 [1] : vector<8x32xf32> to vector<8xf32>
    %121 = vector.shape_cast %120 : vector<8xf32> to vector<8x1xf32>
    %cst_68 = arith.constant 3.200000e+01 : f32
    %122 = vector.broadcast %cst_68 : f32 to vector<8x1xf32>
    %123 = arith.divf %121, %122 : vector<8x1xf32>
    %cst_69 = arith.constant 9.99999974E-6 : f32
    %124 = vector.broadcast %cst_69 : f32 to vector<8x1xf32>
    %125 = arith.addf %123, %124 : vector<8x1xf32>
    %126 = math.rsqrt %125 : vector<8x1xf32>
    %127 = vector.broadcast %126 : vector<8x1xf32> to vector<8x32xf32>
    %128 = arith.mulf %118, %127 : vector<8x32xf32>
    %129 = vector.broadcast %111 : vector<1x32xf32> to vector<8x32xf32>
    %130 = arith.mulf %128, %129 : vector<8x32xf32>
    %131 = vector.broadcast %112 : vector<1x32xf32> to vector<8x32xf32>
    %132 = arith.addf %130, %131 : vector<8x32xf32>
    %133 = arith.truncf %132 : vector<8x32xf32> to vector<8x32xbf16>
    %c0_70 = arith.constant 0 : index
    %c0_71 = arith.constant 0 : index
    %134 = vector.load %arg10[%c0_70, %c0_71] : memref<32x128xbf16, #tpu.memory_space<vmem>>, vector<32x128xbf16>
    %cst_72 = arith.constant dense<0.000000e+00> : vector<8x128xf32>
    %135 = tpu.matmul %133, %134, %cst_72 {dimension_numbers = #tpu.dot_dimension_numbers<[1], [0], [0], [1], [0, 0, 1, 1], [], []>} : vector<8x32xbf16>, vector<32x128xbf16>, vector<8x128xf32> -> vector<8x128xf32>
    %c0_73 = arith.constant 0 : index
    %c0_74 = arith.constant 0 : index
    %136 = vector.load %arg11[%c0_73, %c0_74] : memref<1x128xf32, #tpu.memory_space<vmem>>, vector<1x128xf32>
    %137 = vector.broadcast %136 : vector<1x128xf32> to vector<8x128xf32>
    %138 = arith.addf %135, %137 : vector<8x128xf32>
    %cst_75 = arith.constant 1.702000e+00 : f32
    %139 = vector.broadcast %cst_75 : f32 to vector<8x128xf32>
    %140 = arith.mulf %139, %138 : vector<8x128xf32>
    %141 = arith.negf %140 : vector<8x128xf32>
    %142 = math.exp %141 : vector<8x128xf32>
    %cst_76 = arith.constant 1.000000e+00 : f32
    %143 = vector.broadcast %cst_76 : f32 to vector<8x128xf32>
    %144 = arith.addf %143, %142 : vector<8x128xf32>
    %145 = arith.divf %143, %144 : vector<8x128xf32>
    %146 = arith.mulf %138, %145 : vector<8x128xf32>
    %147 = arith.truncf %146 : vector<8x128xf32> to vector<8x128xbf16>
    %c0_77 = arith.constant 0 : index
    %c0_78 = arith.constant 0 : index
    %148 = vector.load %arg12[%c0_77, %c0_78] : memref<128x32xbf16, #tpu.memory_space<vmem>>, vector<128x32xbf16>
    %cst_79 = arith.constant dense<0.000000e+00> : vector<8x32xf32>
    %149 = tpu.matmul %147, %148, %cst_79 {dimension_numbers = #tpu.dot_dimension_numbers<[1], [0], [0], [1], [0, 0, 1, 1], [], []>} : vector<8x128xbf16>, vector<128x32xbf16>, vector<8x32xf32> -> vector<8x32xf32>
    %c0_80 = arith.constant 0 : index
    %c0_81 = arith.constant 0 : index
    %150 = vector.load %arg13[%c0_80, %c0_81] : memref<1x32xf32, #tpu.memory_space<vmem>>, vector<1x32xf32>
    %151 = vector.broadcast %150 : vector<1x32xf32> to vector<8x32xf32>
    %152 = arith.addf %149, %151 : vector<8x32xf32>
    %153 = arith.addf %110, %152 : vector<8x32xf32>
    %c0_82 = arith.constant 0 : index
    %c0_83 = arith.constant 0 : index
    %c0_84 = arith.constant 0 : index
    %154 = vector.load %arg14[%c0_82, %c0_83, %c0_84] : memref<1x8x32xf32, #tpu.memory_space<vmem>>, vector<1x8x32xf32>
    %155 = vector.shape_cast %154 : vector<1x8x32xf32> to vector<8x32xf32>
    %156 = vector.shape_cast %153 : vector<8x32xf32> to vector<1x8x32xf32>
    tpu.vector_store %arg14[%c0_82, %c0_83, %c0_84], %156 {strides = array<i32>} : memref<1x8x32xf32, #tpu.memory_space<vmem>>, vector<1x8x32xf32>,
    return
  }
  func.func @transform_0(%arg0: i32) -> (i32, i32, i32) {
    %c0_i32 = arith.constant 0 : i32
    %c0_i32_0 = arith.constant 0 : i32
    %c0_i32_1 = arith.constant 0 : i32
    return %arg0, %c0_i32, %c0_i32_0 : i32, i32, i32
  }
  func.func @transform_1(%arg0: i32) -> (i32, i32) {
    %c0_i32 = arith.constant 0 : i32
    %c0_i32_0 = arith.constant 0 : i32
    %c0_i32_1 = arith.constant 0 : i32
    return %c0_i32, %c0_i32_0 : i32, i32
  }
  func.func @transform_2(%arg0: i32) -> (i32, i32) {
    %c0_i32 = arith.constant 0 : i32
    %c0_i32_0 = arith.constant 0 : i32
    %c0_i32_1 = arith.constant 0 : i32
    return %c0_i32, %c0_i32_0 : i32, i32
  }
  func.func @transform_3(%arg0: i32) -> (i32, i32) {
    %c0_i32 = arith.constant 0 : i32
    %c0_i32_0 = arith.constant 0 : i32
    %c0_i32_1 = arith.constant 0 : i32
    return %c0_i32, %c0_i32_0 : i32, i32
  }
  func.func @transform_4(%arg0: i32) -> (i32, i32) {
    %c0_i32 = arith.constant 0 : i32
    %c0_i32_0 = arith.constant 0 : i32
    %c0_i32_1 = arith.constant 0 : i32
    return %c0_i32, %c0_i32_0 : i32, i32
  }
  func.func @transform_5(%arg0: i32) -> (i32, i32) {
    %c0_i32 = arith.constant 0 : i32
    %c0_i32_0 = arith.constant 0 : i32
    %c0_i32_1 = arith.constant 0 : i32
    return %c0_i32, %c0_i32_0 : i32, i32
  }
  func.func @transform_6(%arg0: i32) -> (i32, i32) {
    %c0_i32 = arith.constant 0 : i32
    %c0_i32_0 = arith.constant 0 : i32
    %c0_i32_1 = arith.constant 0 : i32
    return %c0_i32, %c0_i32_0 : i32, i32
  }
  func.func @transform_7(%arg0: i32) -> (i32, i32) {
    %c0_i32 = arith.constant 0 : i32
    %c0_i32_0 = arith.constant 0 : i32
    %c0_i32_1 = arith.constant 0 : i32
    return %c0_i32, %c0_i32_0 : i32, i32
  }
  func.func @transform_8(%arg0: i32) -> (i32, i32) {
    %c0_i32 = arith.constant 0 : i32
    %c0_i32_0 = arith.constant 0 : i32
    %c0_i32_1 = arith.constant 0 : i32
    return %c0_i32, %c0_i32_0 : i32, i32
  }
  func.func @transform_9(%arg0: i32) -> (i32, i32) {
    %c0_i32 = arith.constant 0 : i32
    %c0_i32_0 = arith.constant 0 : i32
    %c0_i32_1 = arith.constant 0 : i32
    return %c0_i32, %c0_i32_0 : i32, i32
  }
  func.func @transform_10(%arg0: i32) -> (i32, i32) {
    %c0_i32 = arith.constant 0 : i32
    %c0_i32_0 = arith.constant 0 : i32
    %c0_i32_1 = arith.constant 0 : i32
    return %c0_i32, %c0_i32_0 : i32, i32
  }
  func.func @transform_11(%arg0: i32) -> (i32, i32) {
    %c0_i32 = arith.constant 0 : i32
    %c0_i32_0 = arith.constant 0 : i32
    %c0_i32_1 = arith.constant 0 : i32
    return %c0_i32, %c0_i32_0 : i32, i32
  }
  func.func @transform_12(%arg0: i32) -> (i32, i32) {
    %c0_i32 = arith.constant 0 : i32
    %c0_i32_0 = arith.constant 0 : i32
    %c0_i32_1 = arith.constant 0 : i32
    return %c0_i32, %c0_i32_0 : i32, i32
  }
  func.func @transform_13(%arg0: i32) -> (i32, i32, i32) {
    %c0_i32 = arith.constant 0 : i32
    %c0_i32_0 = arith.constant 0 : i32
    %c0_i32_1 = arith.constant 0 : i32
    return %arg0, %c0_i32, %c0_i32_0 : i32, i32, i32
  }
}

</mosaic_0001>

<bundles_post_ra>
// kernel: transformer_forward.2
= control target key start
LH: loop header
LB: loop body
LE: loop exit
PB: predicated region body
PF: predicated region fallthrough
CT: control target
= control target key end

     0   :  { %s1703_s25 = smov 0   ;;  %s1900_s0 = inlined_call_operand.vmem [shape: f32[2,8,32], index: 0, kind: input, shape index: {}]   ;;  %s1901_s1 = inlined_call_operand.vmem [shape: f32[1,32], index: 1, kind: input, shape index: {}]   ;;  %s1902_s2 = inlined_call_operand.vmem [shape: f32[1,32], index: 2, kind: input, shape index: {}]   ;;  %s1903_s3 = inlined_call_operand.vmem [shape: bf16[32,96], index: 3, kind: input, shape index: {}]   ;;  %s1904_s4 = inlined_call_operand.vmem [shape: f32[1,96], index: 4, kind: input, shape index: {}]   ;;  %s1905_s5 = inlined_call_operand.vmem [shape: bf16[32,32], index: 5, kind: input, shape index: {}]   ;;  %s1906_s6 = inlined_call_operand.vmem [shape: f32[1,32], index: 6, kind: input, shape index: {}]   ;;  %s1907_s7 = inlined_call_operand.vmem [shape: f32[1,32], index: 7, kind: input, shape index: {}]   ;;  %s1908_s8 = inlined_call_operand.vmem [shape: f32[1,32], index: 8, kind: input, shape index: {}]   ;;  %s1909_s9 = inlined_call_operand.vmem [shape: bf16[32,128], index: 9, kind: input, shape index: {}]   ;;  %s1910_s10 = inlined_call_operand.vmem [shape: f32[1,128], index: 10, kind: input, shape index: {}]   ;;  %s1911_s11 = inlined_call_operand.vmem [shape: bf16[128,32], index: 11, kind: input, shape index: {}]   ;;  %s1912_s12 = inlined_call_operand.vmem [shape: f32[1,32], index: 12, kind: input, shape index: {}]   ;;  %s1913_s13 = inlined_call_operand.vmem [shape: f32[2,8,32], index: 13, kind: output, shape index: {}]  }
   0x1 LB: > { %s1364_s26 = sadd.s32 4294967295, %s1615_s25   ;;  %p1368_p0 = scmp.ge.s32.totalorder %s1615_s25, 1  ;;  %s1615_s25 = sphi %s1703_s25, %s23_s25  }
   0x2   : > { %p386_p1 = scmp.lt.s32.totalorder %s1615_s25, 3 }
   0x4   : > { %p387_p2 = pnand %p1368_p0, %p386_p1 }
   0x5   : > { %p428_p3 = scmp.lt.s32.totalorder (!%p387_p2), %s1364_s26, 1  ;;  %vm440_vm0 = vcmask (!%p387_p2), 261120   ;;  %v1567_v7 = vld [vmem:[%s1903_s3] sm:$0xff] (!%p387_p2)   ;;  %v1617_v8 = vmov (!%p387_p2), 0.0   ;;  %vm1618_vm1 = vmmov (!%p387_p2), 0   ;;  %v1568_v9 = vld [vmem:[%s1903_s3 + $0x8] sm:$0xff] (!%p387_p2)  }
   0x6   : > { %390 = sbr.rel (%p387_p2) target bundleno = 2602 (0xa2a), region = 72  ;;  %1451 = vmatprep.subr.bf16.mxu0 (!%p387_p2), %v1617_v8  ;;  %1455 = vmatprep.mubr.msk.bf16.mxu0 (!%p387_p2), %vm1618_vm1, %v1617_v8  ;;  %v1371_v14 = vld [vmem:[%s1901_s1] ss:$0 sm:$0xff] (!%p387_p2)  ;;  %vm537_vm2 = vcmask (!%p387_p2), 781312   ;;  %s1619_s24 = smov (!%p387_p2), 120   ;;  %vm545_vm3 = vcmask (!%p387_p2), 64512  }
   0x7   : > { %1452 = vmatpush3.bf16.msra.mxu0 (!%p387_p2), %v1567_v7  ;;  %1471 = vmatprep.subr.bf16.mxu1 (!%p387_p2), %v1617_v8  ;;  %v1372_v16 = vld [vmem:[%s1902_s2] ss:$0 sm:$0xff] (!%p387_p2)  ;;  %s1620_s28 = smov (!%p387_p2), 96   ;;  %s1621_s29 = smov (!%p387_p2), 88   ;;  %vm609_vm4 = vcmask (!%p387_p2), 1043456   ;;  %vm654_vm5 = vcmask (!%p387_p2), 60416  }
   0x8   : > { %1453 = vmatprep.subr.bf16.mxu0 (!%p387_p2), %v1617_v8  ;;  %1473 = vmatprep.mubr.msk.bf16.mxu1 (!%p387_p2), %vm1618_vm1, %v1617_v8  ;;  %v1373_v20 = vld [vmem:[%s1904_s4] ss:$0 sm:$0xff] (!%p387_p2)  ;;  %s1623_s14 = smov (!%p387_p2), 112   ;;  %s1624_s15 = smov (!%p387_p2), 72   ;;  %vm777_vm6 = vcmask (!%p387_p2), 126016   ;;  %vm900_vm7 = vcmask (!%p387_p2), 191616  }
   0x9   : > { %s1625_s16 = smov (!%p387_p2), 104   ;;  %s1626_s17 = smov (!%p387_p2), 64   ;;  %vm1023_vm8 = vcmask (!%p387_p2), 257216  }
   0xa   : > { %s1627_s18 = smov (!%p387_p2), 56   ;;  %s1628_s19 = smov (!%p387_p2), 48  }
   0xb   : > { %1454 = vmatpush3.bf16.msra.mxu0 (!%p387_p2), %v1568_v9  ;;  %s1629_s20 = smov (!%p387_p2), 40   ;;  %s1630_s21 = smov (!%p387_p2), 8  }
   0xc   : > { %1459 = vmatprep.subr.bf16.mxu0 (!%p387_p2), %v1617_v8 }
   0xd   : > { %s1915_s26 = smov (!%p428_p3, %s1364_s26), 1 }
   0xe   : > { %s1369_s27 = sshll.u32 %s1915_s26, 3 }
   0xf   : > { %s431_s30 = scalar_lea.vmem %s1900_s0, %s1369_s27 }
  0x10   : > { %v1719_v0 = vld [vmem:[%s431_s30] sm:$0xff]  ;;  %s1622_s30 = smov 80  }
  0x11   : > { %v441_v1 = vsel %vm440_vm0, %v1719_v0, 0.0 }
  0x12   : > { %442 = vadd.xlane.f32.xlu0 %v441_v1 }
  0x9f   : > { %v443_v2 = vpop.xlane.xlu0 %442 }
  0xa0   : > { %v445_v3 = vmul.f32 0.03125, %v443_v2 }
  0xa2   : > { %v446_v4 = vsub.f32 %v1719_v0, %v445_v3 }
  0xa4   : > { %v447_v5 = vmul.f32 %v446_v4, %v446_v4 }
  0xa6   : > { %v448_v6 = vsel %vm440_vm0, %v447_v5, 0.0 }
  0xa7   : > { %449 = vadd.xlane.f32.xlu0 %v448_v6 }
 0x134   : > { %v450_v10 = vpop.xlane.xlu0 %449 }
 0x135   : > { %v451_v11 = vmul.f32 0.03125, %v450_v10 }
 0x137   : > { %v452_v12 = vadd.f32 1e-05, %v451_v11 }
 0x139   : > { %1585 = vrsqrt.f32 %v452_v12 }
 0x143   : > { %v1586_v13 = vpop.eup %1585 }
 0x144   : > { %v454_v15 = vmul.f32 %v1586_v13, %v446_v4 }
 0x146   : > { %v461_v17 = vmul.f32 %v1371_v14, %v454_v15 }
 0x148   : > { %v468_v18 = vadd.f32 %v1372_v16, %v461_v17 }
 0x14a   : > { %v469_v19 = vpack.c.bf16 %v468_v18, %v468_v18 }
 0x14c   : > { %1456 = vmatmul.mubr.msk.bf16.vlgmr.msra.gmra.mrb[0].mxu0 %vm440_vm0, %v469_v19 }
 0x14d   : > { %1461 = vmatprep.mubr.msk.bf16.mxu0 %vm1618_vm1, %v1617_v8 }
 0x21f   : > { %v530_v21 = vpop.f32.mrb[0].mxu0 }
 0x220   : > { %v531_v22 = vadd.f32 %v1373_v20, %v530_v21  ;;  %v1457_v23 = vpop.f32.mrb[1].mxu0 }
 0x221   : > { %v533_v24 = vpop.f32.mrb[2].mxu0 }
 0x222   : > { %v536_v25 = vpack.c.bf16 %v531_v22, %v531_v22  ;;  %v1458_v26 = vpop.f32.mrb[3].mxu0 }
 0x224   : > { %538 = vst.msk [vmem:[#allocation2] sm:$0xf] %vm537_vm2, %v536_v25 }
 0x22b   : > { %v1751_v27 = vld [vmem:[#allocation2] ss:$0 sps:$4 sm:$0xff]  }
 0x22c   : > { %v539_v28 = vld [vmem:[#allocation2] sm:$0xf]  ;;  %660 = vrot.lane.b32.xlu0 %v1751_v27, %s1619_s24 }
 0x22d   : > { %v1753_v29 = vcombine.low %v539_v28, %v539_v28  ;;  %v1758_v30 = vld [vmem:[#allocation2] ss:$0 sps:$4 sm:$0xff]  }
 0x22e   : > { %v1762_v31 = vld [vmem:[#allocation2] ss:$0 sps:$4 sm:$0xff]  }
 0x22f   : > { %543 = vrot.lane.b32.xlu1 %v1753_v29, %s1620_s28 }
 0x233   : > { %662 = vrot.lane.b32.xlu1 %v1751_v27, %s1621_s29  ;;  %s1631_s29 = smov 16  }
 0x237   : > { %785 = vrot.lane.b32.xlu1 %v1758_v30, %s1622_s30  ;;  %s1632_s30 = smov 24  }
 0x23b   : > { %783 = vrot.lane.b32.xlu1 %v1758_v30, %s1623_s14 }
 0x23f   : > { %908 = vrot.lane.b32.xlu1 %v1762_v31, %s1624_s15 }
 0x243   : > { %906 = vrot.lane.b32.xlu1 %v1762_v31, %s1625_s16 }
 0x29e   : > { %v661_v37 = vpop.permute.xlu0 %660 }
 0x2a1   : > { %v544_v32 = vpop.permute.xlu1 %543 }
 0x2a2   : > { %v550_v33 = vsel %vm545_vm3, %v544_v32, 0 }
 0x2a3   : > { %1460 = vmatpush3.bf16.xpose.msra.mxu0 %v550_v33 }
 0x2a4   : > { %1465 = vmatprep.subr.bf16.mxu0 %v1617_v8 }
 0x2a5   : > { %v663_v34 = vpop.permute.xlu1 %662 }
 0x2a6   : > { %v668_v35 = vsel %vm545_vm3, %v663_v34, 0 }
 0x2a7   : > { %1472 = vmatpush3.bf16.xpose.msra.mxu1 %v668_v35 }
 0x2a8   : > { %1483 = vmatprep.subr.bf16.mxu1 %v1617_v8 }
 0x2a9   : > { %v786_v36 = vpop.permute.xlu1 %785 }
 0x2aa   : > { %1462 = vmatmul.mubr.msk.bf16.vlgmr.msra.gmra.mrb[4].mxu0 %vm545_vm3, %v539_v28  ;;  %v791_v39 = vsel %vm545_vm3, %v786_v36, 0 }
 0x2ab   : > { %1467 = vmatprep.mubr.msk.bf16.mxu0 %vm1618_vm1, %v1617_v8 }
 0x2ad   : > { %v784_v38 = vpop.permute.xlu1 %783 }
 0x2ae   : > { %1474 = vmatmul.mubr.msk.bf16.vlgmr.msra.gmra.mrb[0].mxu1 %vm545_vm3, %v661_v37 }
 0x2af   : > { %1484 = vmatpush3.bf16.xpose.msra.mxu1 %v791_v39  ;;  %1485 = vmatprep.mubr.msk.bf16.mxu1 %vm1618_vm1, %v1617_v8 }
 0x2b0   : > { %1495 = vmatprep.subr.bf16.mxu1 %v1617_v8 }
 0x2b1   : > { %v909_v40 = vpop.permute.xlu1 %908 }
 0x2b2   : > { %v914_v41 = vsel %vm545_vm3, %v909_v40, 0 }
 0x2b5   : > { %v907_v42 = vpop.permute.xlu1 %906 }
 0x2b6   : > { %1486 = vmatmul.mubr.msk.bf16.vlgmr.msra.gmra.mrb[4].mxu1 %vm545_vm3, %v784_v38 }
 0x2b7   : > { %1496 = vmatpush3.bf16.xpose.msra.mxu1 %v914_v41  ;;  %1497 = vmatprep.mubr.msk.bf16.mxu1 %vm1618_vm1, %v1617_v8 }
 0x2b8   : > { %1507 = vmatprep.subr.bf16.mxu1 %v1617_v8 }
 0x2be   : > { %1498 = vmatmul.mubr.msk.bf16.vlgmr.msra.gmra.mrb[8].mxu1 %vm545_vm3, %v907_v42 }
 0x2bf   : > { %1511 = vmatprep.mubr.msk.bf16.mxu1 %vm1618_vm1, %v1617_v8 }
 0x37d   : > { %v586_v43 = vpop.f32.mrb[4].mxu0 }
 0x37e   : > { %v1463_v44 = vpop.f32.mrb[5].mxu0  ;;  %v592_v45 = vsel %vm545_vm3, %v586_v43, -inf }
 0x37f   : > { %593 = vmax.xlane.f32.xlu1 %v592_v45  ;;  %v589_v46 = vpop.f32.mrb[6].mxu0 }
 0x380   : > { %v1464_v47 = vpop.f32.mrb[7].mxu0 }
 0x381   : > { %v704_v48 = vpop.f32.mrb[0].mxu1 }
 0x382   : > { %v1475_v49 = vpop.f32.mrb[1].mxu1  ;;  %v710_v50 = vsel %vm545_vm3, %v704_v48, -inf }
 0x383   : > { %711 = vmax.xlane.f32.xlu0 %v710_v50  ;;  %v707_v51 = vpop.f32.mrb[2].mxu1 }
 0x384   : > { %v1476_v52 = vpop.f32.mrb[3].mxu1 }
 0x389   : > { %v827_v53 = vpop.f32.mrb[4].mxu1 }
 0x38a   : > { %v1487_v54 = vpop.f32.mrb[5].mxu1  ;;  %v833_v55 = vsel %vm545_vm3, %v827_v53, -inf }
 0x38b   : > { %v830_v56 = vpop.f32.mrb[6].mxu1  ;;  %834 = vmax.xlane.f32.xlu1 %v833_v55  ;;  %v1573_v55 = vld [vmem:[%s1905_s5] sm:$0xff]  }
 0x38c   : > { %v1488_v57 = vpop.f32.mrb[7].mxu1  ;;  %1508 = vmatpush3.bf16.msra.mxu1 %v1573_v55 }
 0x38d   : > { %v1574_v57 = vld [vmem:[%s1905_s5 + $0x8] sm:$0xff]   ;;  %1509 = vmatprep.subr.bf16.mxu1 %v1617_v8 }
 0x390   : > { %1510 = vmatpush3.bf16.msra.mxu1 %v1574_v57 }
 0x391   : > { %v950_v58 = vpop.f32.mrb[8].mxu1  ;;  %1523 = vmatprep.subr.bf16.mxu1 %v1617_v8 }
 0x392   : > { %v1499_v59 = vpop.f32.mrb[9].mxu1  ;;  %v956_v60 = vsel %vm545_vm3, %v950_v58, -inf }
 0x393   : > { %957 = vmax.xlane.f32.xlu0 %v956_v60  ;;  %v953_v61 = vpop.f32.mrb[10].mxu1 }
 0x394   : > { %v1500_v62 = vpop.f32.mrb[11].mxu1 }
 0x40c   : > { %v594_v63 = vpop.xlane.xlu1 %593 }
 0x40d   : > { %v595_v1 = vsub.f32 %v586_v43, %v594_v63 }
 0x40f   : > { %v596_v2 = vmul.f32 1.442695, %v595_v1 }
 0x410   : > { %v712_v3 = vpop.xlane.xlu0 %711 }
 0x411   : > { %1587 = vpow2.f32 %v596_v2  ;;  %v713_v4 = vsub.f32 %v704_v48, %v712_v3 }
 0x413   : > { %v714_v5 = vmul.f32 1.442695, %v713_v4 }
 0x415   : > { %1589 = vpow2.f32 %v714_v5 }
 0x418   : > { %v835_v16 = vpop.xlane.xlu1 %834 }
 0x419   : > { %v836_v17 = vsub.f32 %v827_v53, %v835_v16 }
 0x41b   : > { %v1588_v6 = vpop.eup %1587  ;;  %v837_v18 = vmul.f32 1.442695, %v836_v17 }
 0x41c   : > { %v598_v7 = vsel %vm545_vm3, %v1588_v6, 0.0 }
 0x41d   : > { %599 = vadd.xlane.f32.xlu1 %v598_v7 }
 0x41f   : > { %v1590_v9 = vpop.eup %1589 }
 0x420   : > { %v958_v10 = vpop.xlane.xlu0 %957  ;;  %v716_v11 = vsel %vm545_vm3, %v1590_v9, 0.0 }
 0x421   : > { %v959_v12 = vsub.f32 %v950_v58, %v958_v10  ;;  %717 = vadd.xlane.f32.xlu0 %v716_v11 }
 0x423   : > { %v960_v13 = vmul.f32 1.442695, %v959_v12 }
 0x425   : > { %1591 = vpow2.f32 %v960_v13 }
 0x426   : > { %1593 = vpow2.f32 %v837_v18 }
 0x42e   : > { %604 = vrot.lane.b32.xlu1 %v1753_v29, %s1626_s17 }
 0x42f   : > { %v1592_v14 = vpop.eup %1591 }
 0x430   : > { %v962_v15 = vsel %vm545_vm3, %v1592_v14, 0.0  ;;  %v1594_v19 = vpop.eup %1593 }
 0x431   : > { %963 = vadd.xlane.f32.xlu0 %v962_v15  ;;  %v839_v20 = vsel %vm545_vm3, %v1594_v19, 0.0 }
 0x447   : > { %722 = vrot.lane.b32.xlu0 %v1751_v27, %s1627_s18  ;;  %s435_s18 = scalar_lea.vmem %s1913_s13, %s1369_s27 }
 0x452   : > { %840 = vadd.xlane.f32.xlu1 %v839_v20 }
 0x463   : > { %845 = vrot.lane.b32.xlu1 %v1758_v30, %s1628_s19 }
 0x467   : > { %968 = vrot.lane.b32.xlu1 %v1762_v31, %s1629_s20 }
 0x4aa   : > { %v600_v21 = vpop.xlane.xlu1 %599 }
 0x4ab   : > { %1595 = vrcp.f32 %v600_v21 }
 0x4ae   : > { %v605_v22 = vpop.permute.xlu1 %604  ;;  %v718_v24 = vpop.xlane.xlu0 %717 }
 0x4af   : > { %v611_v23 = vsel %vm609_vm4, %v605_v22, 0  ;;  %1597 = vrcp.f32 %v718_v24  ;;  %v1575_v22 = vld [vmem:[%s1909_s9] sm:$0xff]  }
 0x4b0   : > { %1466 = vmatpush3.bf16.msra.mxu0 %v611_v23 }
 0x4b1   : > { %1477 = vmatprep.subr.bf16.mxu0 %v1617_v8 }
 0x4b5   : > { %v1596_v25 = vpop.eup %1595 }
 0x4b6   : > { %v602_v26 = vmul.f32 %v1596_v25, %v1588_v6 }
 0x4b8   : > { %v603_v27 = vpack.c.bf16 %v602_v26, %v602_v26 }
 0x4b9   : > { %v1598_v28 = vpop.eup %1597 }
 0x4ba   : > { %1468 = vmatmul.mubr.msk.bf16.vlgmr.msra.gmra.mrb[8].mxu0 %vm545_vm3, %v603_v27  ;;  %v720_v30 = vmul.f32 %v1598_v28, %v1590_v9  ;;  %v1392_v9 = vld [vmem:[%s1906_s6] ss:$0 sm:$0xff] }
 0x4bb   : > { %1479 = vmatprep.mubr.msk.bf16.mxu0 %vm1618_vm1, %v1617_v8  ;;  %v1396_v27 = vld [vmem:[%s1907_s7] ss:$0 sm:$0xff] }
 0x4bc   : > { %v721_v33 = vpack.c.bf16 %v720_v30, %v720_v30 }
 0x4be   : > { %v964_v29 = vpop.xlane.xlu0 %963 }
 0x4c2   : > { %v723_v31 = vpop.permute.xlu0 %722 }
 0x4c3   : > { %v728_v32 = vsel %vm609_vm4, %v723_v31, 0 }
 0x4c4   : > { %1478 = vmatpush3.bf16.msra.mxu0 %v728_v32 }
 0x4c5   : > { %1489 = vmatprep.subr.bf16.mxu0 %v1617_v8 }
 0x4c7   : > { %1480 = vmatmul.mubr.msk.bf16.vlgmr.msra.gmra.mrb[12].mxu0 %vm545_vm3, %v721_v33  ;;  %v1577_v33 = vld [vmem:[%s1911_s11] sm:$0xff]  }
 0x4c8   : > { %1491 = vmatprep.mubr.msk.bf16.mxu0 %vm1618_vm1, %v1617_v8 }
 0x4df   : > { %v841_v34 = vpop.xlane.xlu1 %840 }
 0x4e0   : > { %1599 = vrcp.f32 %v841_v34  ;;  %v1578_v34 = vld [vmem:[%s1911_s11 + $0x8] sm:$0xff]  }
 0x4e1   : > { %1601 = vrcp.f32 %v964_v29  ;;  %v1397_v29 = vld [vmem:[%s1908_s8] ss:$0 sm:$0xff] }
 0x4e3   : > { %v846_v35 = vpop.permute.xlu1 %845 }
 0x4e4   : > { %v851_v36 = vsel %vm609_vm4, %v846_v35, 0  ;;  %v1579_v35 = vld [vmem:[%s1911_s11 + $0x10] sm:$0xff]  }
 0x4e5   : > { %1490 = vmatpush3.bf16.msra.mxu0 %v851_v36  ;;  %v1580_v36 = vld [vmem:[%s1911_s11 + $0x18] sm:$0xff]  }
 0x4e6   : > { %1501 = vmatprep.subr.bf16.mxu0 %v1617_v8 }
 0x4e7   : > { %v969_v39 = vpop.permute.xlu1 %968 }
 0x4e8   : > { %v974_v42 = vsel %vm609_vm4, %v969_v39, 0  ;;  %v1583_v39 = vld [vmem:[%s1911_s11 + $0x30] sm:$0xff]  }
 0x4ea   : > { %v1600_v37 = vpop.eup %1599 }
 0x4eb   : > { %v843_v38 = vmul.f32 %v1600_v37, %v1594_v19  ;;  %v1602_v41 = vpop.eup %1601  ;;  %v1581_v37 = vld [vmem:[%s1911_s11 + $0x20] sm:$0xff]  }
 0x4ec   : > { %v966_v43 = vmul.f32 %v1602_v41, %v1592_v14  ;;  %v1398_v41 = vld [vmem:[%s1910_s10] ss:$0 sm:$0xff] }
 0x4ed   : > { %v844_v40 = vpack.c.bf16 %v843_v38, %v843_v38  ;;  %v1582_v38 = vld [vmem:[%s1911_s11 + $0x28] sm:$0xff]  }
 0x4ee   : > { %v967_v44 = vpack.c.bf16 %v966_v43, %v966_v43 }
 0x4ef   : > { %1492 = vmatmul.mubr.msk.bf16.vlgmr.msra.gmra.mrb[16].mxu0 %vm545_vm3, %v844_v40  ;;  %v1584_v40 = vld [vmem:[%s1911_s11 + $0x38] sm:$0xff]  }
 0x4f0   : > { %1502 = vmatpush3.bf16.msra.mxu0 %v974_v42  ;;  %1503 = vmatprep.mubr.msk.bf16.mxu0 %vm1618_vm1, %v1617_v8 }
 0x4f1   : > { %1515 = vmatprep.subr.bf16.mxu0 %v1617_v8 }
 0x4f7   : > { %1504 = vmatmul.mubr.msk.bf16.vlgmr.msra.gmra.mrb[20].mxu0 %vm545_vm3, %v967_v44 }
 0x4f8   : > { %1519 = vmatprep.mubr.msk.bf16.mxu0 %vm1618_vm1, %v1617_v8  ;;  %1516 = vmatpush3.bf16.msra.mxu0 %v1575_v22 }
 0x4f9   : > { %1517 = vmatprep.subr.bf16.mxu0 %v1617_v8 }
 0x58d   : > { %v647_v45 = vpop.f32.mrb[8].mxu0 }
 0x58e   : > { %v653_v46 = vpack.c.bf16 %v647_v45, %v647_v45  ;;  %v1469_v47 = vpop.f32.mrb[9].mxu0 }
 0x58f   : > { %v650_v48 = vpop.f32.mrb[10].mxu0 }
 0x590   : > { %655 = vst.msk [vmem:[#allocation3] sm:$0xf] %vm654_vm5, %v653_v46  ;;  %v1470_v49 = vpop.f32.mrb[11].mxu0 }
 0x59a   : > { %v764_v50 = vpop.f32.mrb[12].mxu0 }
 0x59b   : > { %v1414_v51 = vpack.c.bf16 %v764_v50, %v764_v50  ;;  %v1481_v52 = vpop.f32.mrb[13].mxu0 }
 0x59c   : > { %v767_v53 = vpop.f32.mrb[14].mxu0 }
 0x59d   : > { %774 = vrot.lane.b32.xlu0 %v1414_v51, %s1630_s21  ;;  %v1482_v54 = vpop.f32.mrb[15].mxu0  ;;  %v1403_v53 = vld [vmem:[%s1912_s12] ss:$0 sm:$0xff] }
 0x5c2   : > { %v887_v56 = vpop.f32.mrb[16].mxu0 }
 0x5c3   : > { %v1415_v58 = vpack.c.bf16 %v887_v56, %v887_v56  ;;  %v1493_v59 = vpop.f32.mrb[17].mxu0 }
 0x5c4   : > { %v890_v60 = vpop.f32.mrb[18].mxu0 }
 0x5c5   : > { %897 = vrot.lane.b32.xlu1 %v1415_v58, %s1631_s29  ;;  %v1494_v61 = vpop.f32.mrb[19].mxu0 }
 0x5ca   : > { %v1010_v62 = vpop.f32.mrb[20].mxu0 }
 0x5cb   : > { %v1416_v63 = vpack.c.bf16 %v1010_v62, %v1010_v62  ;;  %v1505_v1 = vpop.f32.mrb[21].mxu0 }
 0x5cc   : > { %v1013_v2 = vpop.f32.mrb[22].mxu0 }
 0x5cd   : > { %1020 = vrot.lane.b32.xlu0 %v1416_v63, %s1632_s30  ;;  %v1506_v3 = vpop.f32.mrb[23].mxu0 }
 0x60f   : > { %v775_v4 = vpop.permute.xlu0 %774 }
 0x610   : > { %778 = vst.msk [vmem:[#allocation3] sm:$0xf] %vm777_vm6, %v775_v4 }
 0x637   : > { %v898_v5 = vpop.permute.xlu1 %897 }
 0x638   : > { %901 = vst.msk [vmem:[#allocation3] sm:$0xf] %vm900_vm7, %v898_v5 }
 0x63f   : > { %v1021_v6 = vpop.permute.xlu0 %1020 }
 0x640   : > { %1024 = vst.msk [vmem:[#allocation3] sm:$0xf] %vm1023_vm8, %v1021_v6 }
 0x647   : > { %v1025_v7 = vld [vmem:[#allocation3] sm:$0xf] }
 0x648   : > { %1512 = vmatmul.mubr.msk.bf16.vlgmr.msra.gmra.mrb[12].mxu1 %vm440_vm0, %v1025_v7 }
 0x649   : > { %1539 = vmatprep.mubr.msk.bf16.mxu1 %vm1618_vm1, %v1617_v8  ;;  %1524 = vmatpush3.bf16.msra.mxu1 %v1577_v33 }
 0x64a   : > { %1525 = vmatprep.subr.bf16.mxu1 %v1617_v8 }
 0x64d   : > { %1526 = vmatpush3.bf16.msra.mxu1 %v1578_v34 }
 0x64e   : > { %1527 = vmatprep.subr.bf16.mxu1 %v1617_v8 }
 0x651   : > { %1528 = vmatpush3.bf16.msra.mxu1 %v1579_v35 }
 0x652   : > { %1529 = vmatprep.subr.bf16.mxu1 %v1617_v8 }
 0x655   : > { %1530 = vmatpush3.bf16.msra.mxu1 %v1580_v36 }
 0x656   : > { %1531 = vmatprep.subr.bf16.mxu1 %v1617_v8 }
 0x659   : > { %1532 = vmatpush3.bf16.msra.mxu1 %v1581_v37 }
 0x65a   : > { %1533 = vmatprep.subr.bf16.mxu1 %v1617_v8 }
 0x65d   : > { %1534 = vmatpush3.bf16.msra.mxu1 %v1582_v38 }
 0x65e   : > { %1535 = vmatprep.subr.bf16.mxu1 %v1617_v8 }
 0x661   : > { %1536 = vmatpush3.bf16.msra.mxu1 %v1583_v39 }
 0x662   : > { %1537 = vmatprep.subr.bf16.mxu1 %v1617_v8 }
 0x665   : > { %1538 = vmatpush3.bf16.msra.mxu1 %v1584_v40 }
 0x71b   : > { %v1086_v10 = vpop.f32.mrb[12].mxu1 }
 0x71c   : > { %v1087_v11 = vadd.f32 %v1392_v9, %v1086_v10  ;;  %v1513_v12 = vpop.f32.mrb[13].mxu1 }
 0x71d   : > { %v1089_v13 = vpop.f32.mrb[14].mxu1 }
 0x71e   : > { %v1833_v14 = vadd.f32 %v1087_v11, %v1719_v0  ;;  %v1514_v15 = vpop.f32.mrb[15].mxu1  ;;  %v1576_v0 = vld [vmem:[%s1909_s9 + $0x8] sm:$0xff]  }
 0x71f   : > { %1518 = vmatpush3.bf16.msra.mxu0 %v1576_v0 }
 0x720   : > { %v1095_v16 = vsel %vm440_vm0, %v1833_v14, 0.0 }
 0x721   : > { %1096 = vadd.xlane.f32.xlu1 %v1095_v16 }
 0x7ae   : > { %v1097_v17 = vpop.xlane.xlu1 %1096 }
 0x7af   : > { %v1098_v18 = vmul.f32 0.03125, %v1097_v17 }
 0x7b1   : > { %v1099_v19 = vsub.f32 %v1833_v14, %v1098_v18 }
 0x7b3   : > { %v1100_v20 = vmul.f32 %v1099_v19, %v1099_v19 }
 0x7b5   : > { %v1101_v21 = vsel %vm440_vm0, %v1100_v20, 0.0 }
 0x7b6   : > { %1102 = vadd.xlane.f32.xlu0 %v1101_v21 }
 0x843   : > { %v1103_v23 = vpop.xlane.xlu0 %1102 }
 0x844   : > { %v1104_v24 = vmul.f32 0.03125, %v1103_v23 }
 0x846   : > { %v1105_v25 = vadd.f32 1e-05, %v1104_v24 }
 0x848   : > { %1603 = vrsqrt.f32 %v1105_v25 }
 0x852   : > { %v1604_v26 = vpop.eup %1603 }
 0x853   : > { %v1107_v28 = vmul.f32 %v1604_v26, %v1099_v19 }
 0x855   : > { %v1114_v30 = vmul.f32 %v1396_v27, %v1107_v28 }
 0x857   : > { %v1121_v31 = vadd.f32 %v1397_v29, %v1114_v30 }
 0x859   : > { %v1122_v32 = vpack.c.bf16 %v1121_v31, %v1121_v31 }
 0x85b   : > { %1520 = vmatmul.mubr.msk.bf16.vlgmr.msra.gmra.mrb[24].mxu0 %vm440_vm0, %v1122_v32 }
 0x92e   : > { %v1183_v42 = vpop.f32.mrb[24].mxu0 }
 0x92f   : > { %v1184_v43 = vadd.f32 %v1398_v41, %v1183_v42  ;;  %v1521_v44 = vpop.f32.mrb[25].mxu0 }
 0x930   : > { %v1186_v45 = vpop.f32.mrb[26].mxu0 }
 0x931   : > { %v1402_v46 = vmul.f32 -1.702, %v1184_v43  ;;  %v1522_v47 = vpop.f32.mrb[27].mxu0 }
 0x933   : > { %v1191_v48 = vmul.f32 1.442695, %v1402_v46 }
 0x935   : > { %1605 = vpow2.f32 %v1191_v48 }
 0x93f   : > { %v1606_v49 = vpop.eup %1605 }
 0x940   : > { %v1193_v8 = vadd.f32 1.0, %v1606_v49 }
 0x942   : > { %1607 = vrcp.f32 %v1193_v8 }
 0x94c   : > { %v1608_v50 = vpop.eup %1607 }
 0x94d   : > { %v1196_v51 = vmul.f32 %v1608_v50, %v1184_v43 }
 0x94f   : > { %v1197_v52 = vpack.c.bf16 %v1196_v51, %v1196_v51 }
 0x951   : > { %1540 = vmatmul.mubr.bf16.vlgmr.msra.gmra.mrb[16].mxu1 %v1197_v52 }
 0xa24   : > { %v1303_v54 = vpop.f32.mrb[16].mxu1 }
 0xa25   : > { %v1304_v55 = vadd.f32 %v1403_v53, %v1303_v54  ;;  %v1541_v56 = vpop.f32.mrb[17].mxu1 }
 0xa26   : > { %v1306_v57 = vpop.f32.mrb[18].mxu1 }
 0xa27   : > { %v1309_v58 = vadd.f32 %v1304_v55, %v1833_v14  ;;  %v1542_v59 = vpop.f32.mrb[19].mxu1 }
 0xa29   : > { %1310 = vst.msk [vmem:[%s435_s18] sm:$0xff] %vm440_vm0, %v1309_v58 }
 0xa2a PF: > { %s23_s25 = sadd.s32 1, %s1615_s25  }
 0xa2b   : > { %p20_p4 = scmp.ge.s32.totalorder %s23_s25, 4  }
 0xa2d   :  { %22 = sbr.rel (!%p20_p4) target bundleno = 1 (0x1), region = 102 }

// kernel: transformer_forward.2
= control target key start
LH: loop header
LB: loop body
LE: loop exit
PB: predicated region body
PF: predicated region fallthrough
CT: control target
= control target key end

     0   :  { %s1703_s25 = smov 0   ;;  %s1900_s0 = inlined_call_operand.vmem [shape: f32[2,8,32], index: 0, kind: input, shape index: {}]   ;;  %s1901_s1 = inlined_call_operand.vmem [shape: f32[1,32], index: 1, kind: input, shape index: {}]   ;;  %s1902_s2 = inlined_call_operand.vmem [shape: f32[1,32], index: 2, kind: input, shape index: {}]   ;;  %s1903_s3 = inlined_call_operand.vmem [shape: bf16[32,96], index: 3, kind: input, shape index: {}]   ;;  %s1904_s4 = inlined_call_operand.vmem [shape: f32[1,96], index: 4, kind: input, shape index: {}]   ;;  %s1905_s5 = inlined_call_operand.vmem [shape: bf16[32,32], index: 5, kind: input, shape index: {}]   ;;  %s1906_s6 = inlined_call_operand.vmem [shape: f32[1,32], index: 6, kind: input, shape index: {}]   ;;  %s1907_s7 = inlined_call_operand.vmem [shape: f32[1,32], index: 7, kind: input, shape index: {}]   ;;  %s1908_s8 = inlined_call_operand.vmem [shape: f32[1,32], index: 8, kind: input, shape index: {}]   ;;  %s1909_s9 = inlined_call_operand.vmem [shape: bf16[32,128], index: 9, kind: input, shape index: {}]   ;;  %s1910_s10 = inlined_call_operand.vmem [shape: f32[1,128], index: 10, kind: input, shape index: {}]   ;;  %s1911_s11 = inlined_call_operand.vmem [shape: bf16[128,32], index: 11, kind: input, shape index: {}]   ;;  %s1912_s12 = inlined_call_operand.vmem [shape: f32[1,32], index: 12, kind: input, shape index: {}]   ;;  %s1913_s13 = inlined_call_operand.vmem [shape: f32[2,8,32], index: 13, kind: output, shape index: {}]  }
   0x1 LB: > { %s1364_s26 = sadd.s32 4294967295, %s1615_s25   ;;  %p1368_p0 = scmp.ge.s32.totalorder %s1615_s25, 1  ;;  %s1615_s25 = sphi %s1703_s25, %s23_s25  }
   0x2   : > { %p386_p1 = scmp.lt.s32.totalorder %s1615_s25, 3 }
   0x4   : > { %p387_p2 = pnand %p1368_p0, %p386_p1 }
   0x5   : > { %p428_p3 = scmp.lt.s32.totalorder (!%p387_p2), %s1364_s26, 1  ;;  %vm440_vm0 = vcmask (!%p387_p2), 261120   ;;  %v1567_v7 = vld [vmem:[%s1903_s3] sm:$0xff] (!%p387_p2)   ;;  %v1617_v8 = vmov (!%p387_p2), 0.0   ;;  %vm1618_vm1 = vmmov (!%p387_p2), 0   ;;  %v1568_v9 = vld [vmem:[%s1903_s3 + $0x8] sm:$0xff] (!%p387_p2)  }
   0x6   : > { %390 = sbr.rel (%p387_p2) target bundleno = 2602 (0xa2a), region = 72  ;;  %1451 = vmatprep.subr.bf16.mxu0 (!%p387_p2), %v1617_v8  ;;  %1455 = vmatprep.mubr.msk.bf16.mxu0 (!%p387_p2), %vm1618_vm1, %v1617_v8  ;;  %v1371_v14 = vld [vmem:[%s1901_s1] ss:$0 sm:$0xff] (!%p387_p2)  ;;  %vm537_vm2 = vcmask (!%p387_p2), 781312   ;;  %s1619_s24 = smov (!%p387_p2), 120   ;;  %vm545_vm3 = vcmask (!%p387_p2), 64512  }
   0x7   : > { %1452 = vmatpush3.bf16.msra.mxu0 (!%p387_p2), %v1567_v7  ;;  %1471 = vmatprep.subr.bf16.mxu1 (!%p387_p2), %v1617_v8  ;;  %v1372_v16 = vld [vmem:[%s1902_s2] ss:$0 sm:$0xff] (!%p387_p2)  ;;  %s1620_s28 = smov (!%p387_p2), 96   ;;  %s1621_s29 = smov (!%p387_p2), 88   ;;  %vm609_vm4 = vcmask (!%p387_p2), 1043456   ;;  %vm654_vm5 = vcmask (!%p387_p2), 60416  }
   0x8   : > { %1453 = vmatprep.subr.bf16.mxu0 (!%p387_p2), %v1617_v8  ;;  %1473 = vmatprep.mubr.msk.bf16.mxu1 (!%p387_p2), %vm1618_vm1, %v1617_v8  ;;  %v1373_v20 = vld [vmem:[%s1904_s4] ss:$0 sm:$0xff] (!%p387_p2)  ;;  %s1623_s14 = smov (!%p387_p2), 112   ;;  %s1624_s15 = smov (!%p387_p2), 72   ;;  %vm777_vm6 = vcmask (!%p387_p2), 126016   ;;  %vm900_vm7 = vcmask (!%p387_p2), 191616  }
   0x9   : > { %s1625_s16 = smov (!%p387_p2), 104   ;;  %s1626_s17 = smov (!%p387_p2), 64   ;;  %vm1023_vm8 = vcmask (!%p387_p2), 257216  }
   0xa   : > { %s1627_s18 = smov (!%p387_p2), 56   ;;  %s1628_s19 = smov (!%p387_p2), 48  }
   0xb   : > { %1454 = vmatpush3.bf16.msra.mxu0 (!%p387_p2), %v1568_v9  ;;  %s1629_s20 = smov (!%p387_p2), 40   ;;  %s1630_s21 = smov (!%p387_p2), 8  }
   0xc   : > { %1459 = vmatprep.subr.bf16.mxu0 (!%p387_p2), %v1617_v8 }
   0xd   : > { %s1915_s26 = smov (!%p428_p3, %s1364_s26), 1 }
   0xe   : > { %s1369_s27 = sshll.u32 %s1915_s26, 3 }
   0xf   : > { %s431_s30 = scalar_lea.vmem %s1900_s0, %s1369_s27 }
  0x10   : > { %v1719_v0 = vld [vmem:[%s431_s30] sm:$0xff]  ;;  %s1622_s30 = smov 80  }
  0x11   : > { %v441_v1 = vsel %vm440_vm0, %v1719_v0, 0.0 }
  0x12   : > { %442 = vadd.xlane.f32.xlu0 %v441_v1 }
  0x9f   : > { %v443_v2 = vpop.xlane.xlu0 %442 }
  0xa0   : > { %v445_v3 = vmul.f32 0.03125, %v443_v2 }
  0xa2   : > { %v446_v4 = vsub.f32 %v1719_v0, %v445_v3 }
  0xa4   : > { %v447_v5 = vmul.f32 %v446_v4, %v446_v4 }
  0xa6   : > { %v448_v6 = vsel %vm440_vm0, %v447_v5, 0.0 }
  0xa7   : > { %449 = vadd.xlane.f32.xlu0 %v448_v6 }
 0x134   : > { %v450_v10 = vpop.xlane.xlu0 %449 }
 0x135   : > { %v451_v11 = vmul.f32 0.03125, %v450_v10 }
 0x137   : > { %v452_v12 = vadd.f32 1e-05, %v451_v11 }
 0x139   : > { %1585 = vrsqrt.f32 %v452_v12 }
 0x143   : > { %v1586_v13 = vpop.eup %1585 }
 0x144   : > { %v454_v15 = vmul.f32 %v1586_v13, %v446_v4 }
 0x146   : > { %v461_v17 = vmul.f32 %v1371_v14, %v454_v15 }
 0x148   : > { %v468_v18 = vadd.f32 %v1372_v16, %v461_v17 }
 0x14a   : > { %v469_v19 = vpack.c.bf16 %v468_v18, %v468_v18 }
 0x14c   : > { %1456 = vmatmul.mubr.msk.bf16.vlgmr.msra.gmra.mrb[0].mxu0 %vm440_vm0, %v469_v19 }
 0x14d   : > { %1461 = vmatprep.mubr.msk.bf16.mxu0 %vm1618_vm1, %v1617_v8 }
 0x21f   : > { %v530_v21 = vpop.f32.mrb[0].mxu0 }
 0x220   : > { %v531_v22 = vadd.f32 %v1373_v20, %v530_v21  ;;  %v1457_v23 = vpop.f32.mrb[1].mxu0 }
 0x221   : > { %v533_v24 = vpop.f32.mrb[2].mxu0 }
 0x222   : > { %v536_v25 = vpack.c.bf16 %v531_v22, %v531_v22  ;;  %v1458_v26 = vpop.f32.mrb[3].mxu0 }
 0x224   : > { %538 = vst.msk [vmem:[#allocation2] sm:$0xf] %vm537_vm2, %v536_v25 }
 0x22b   : > { %v1751_v27 = vld [vmem:[#allocation2] ss:$0 sps:$4 sm:$0xff]  }
 0x22c   : > { %v539_v28 = vld [vmem:[#allocation2] sm:$0xf]  ;;  %660 = vrot.lane.b32.xlu0 %v1751_v27, %s1619_s24 }
 0x22d   : > { %v1753_v29 = vcombine.low %v539_v28, %v539_v28  ;;  %v1758_v30 = vld [vmem:[#allocation2] ss:$0 sps:$4 sm:$0xff]  }
 0x22e   : > { %v1762_v31 = vld [vmem:[#allocation2] ss:$0 sps:$4 sm:$0xff]  }
 0x22f   : > { %543 = vrot.lane.b32.xlu1 %v1753_v29, %s1620_s28 }
 0x233   : > { %662 = vrot.lane.b32.xlu1 %v1751_v27, %s1621_s29  ;;  %s1631_s29 = smov 16  }
 0x237   : > { %785 = vrot.lane.b32.xlu1 %v1758_v30, %s1622_s30  ;;  %s1632_s30 = smov 24  }
 0x23b   : > { %783 = vrot.lane.b32.xlu1 %v1758_v30, %s1623_s14 }
 0x23f   : > { %908 = vrot.lane.b32.xlu1 %v1762_v31, %s1624_s15 }
 0x243   : > { %906 = vrot.lane.b32.xlu1 %v1762_v31, %s1625_s16 }
 0x29e   : > { %v661_v37 = vpop.permute.xlu0 %660 }
 0x2a1   : > { %v544_v32 = vpop.permute.xlu1 %543 }
 0x2a2   : > { %v550_v33 = vsel %vm545_vm3, %v544_v32, 0 }
 0x2a3   : > { %1460 = vmatpush3.bf16.xpose.msra.mxu0 %v550_v33 }
 0x2a4   : > { %1465 = vmatprep.subr.bf16.mxu0 %v1617_v8 }
 0x2a5   : > { %v663_v34 = vpop.permute.xlu1 %662 }
 0x2a6   : > { %v668_v35 = vsel %vm545_vm3, %v663_v34, 0 }
 0x2a7   : > { %1472 = vmatpush3.bf16.xpose.msra.mxu1 %v668_v35 }
 0x2a8   : > { %1483 = vmatprep.subr.bf16.mxu1 %v1617_v8 }
 0x2a9   : > { %v786_v36 = vpop.permute.xlu1 %785 }
 0x2aa   : > { %1462 = vmatmul.mubr.msk.bf16.vlgmr.msra.gmra.mrb[4].mxu0 %vm545_vm3, %v539_v28  ;;  %v791_v39 = vsel %vm545_vm3, %v786_v36, 0 }
 0x2ab   : > { %1467 = vmatprep.mubr.msk.bf16.mxu0 %vm1618_vm1, %v1617_v8 }
 0x2ad   : > { %v784_v38 = vpop.permute.xlu1 %783 }
 0x2ae   : > { %1474 = vmatmul.mubr.msk.bf16.vlgmr.msra.gmra.mrb[0].mxu1 %vm545_vm3, %v661_v37 }
 0x2af   : > { %1484 = vmatpush3.bf16.xpose.msra.mxu1 %v791_v39  ;;  %1485 = vmatprep.mubr.msk.bf16.mxu1 %vm1618_vm1, %v1617_v8 }
 0x2b0   : > { %1495 = vmatprep.subr.bf16.mxu1 %v1617_v8 }
 0x2b1   : > { %v909_v40 = vpop.permute.xlu1 %908 }
 0x2b2   : > { %v914_v41 = vsel %vm545_vm3, %v909_v40, 0 }
 0x2b5   : > { %v907_v42 = vpop.permute.xlu1 %906 }
 0x2b6   : > { %1486 = vmatmul.mubr.msk.bf16.vlgmr.msra.gmra.mrb[4].mxu1 %vm545_vm3, %v784_v38 }
 0x2b7   : > { %1496 = vmatpush3.bf16.xpose.msra.mxu1 %v914_v41  ;;  %1497 = vmatprep.mubr.msk.bf16.mxu1 %vm1618_vm1, %v1617_v8 }
 0x2b8   : > { %1507 = vmatprep.subr.bf16.mxu1 %v1617_v8 }
 0x2be   : > { %1498 = vmatmul.mubr.msk.bf16.vlgmr.msra.gmra.mrb[8].mxu1 %vm545_vm3, %v907_v42 }
 0x2bf   : > { %1511 = vmatprep.mubr.msk.bf16.mxu1 %vm1618_vm1, %v1617_v8 }
 0x37d   : > { %v586_v43 = vpop.f32.mrb[4].mxu0 }
 0x37e   : > { %v1463_v44 = vpop.f32.mrb[5].mxu0  ;;  %v592_v45 = vsel %vm545_vm3, %v586_v43, -inf }
 0x37f   : > { %593 = vmax.xlane.f32.xlu1 %v592_v45  ;;  %v589_v46 = vpop.f32.mrb[6].mxu0 }
 0x380   : > { %v1464_v47 = vpop.f32.mrb[7].mxu0 }
 0x381   : > { %v704_v48 = vpop.f32.mrb[0].mxu1 }
 0x382   : > { %v1475_v49 = vpop.f32.mrb[1].mxu1  ;;  %v710_v50 = vsel %vm545_vm3, %v704_v48, -inf }
 0x383   : > { %711 = vmax.xlane.f32.xlu0 %v710_v50  ;;  %v707_v51 = vpop.f32.mrb[2].mxu1 }
 0x384   : > { %v1476_v52 = vpop.f32.mrb[3].mxu1 }
 0x389   : > { %v827_v53 = vpop.f32.mrb[4].mxu1 }
 0x38a   : > { %v1487_v54 = vpop.f32.mrb[5].mxu1  ;;  %v833_v55 = vsel %vm545_vm3, %v827_v53, -inf }
 0x38b   : > { %v830_v56 = vpop.f32.mrb[6].mxu1  ;;  %834 = vmax.xlane.f32.xlu1 %v833_v55  ;;  %v1573_v55 = vld [vmem:[%s1905_s5] sm:$0xff]  }
 0x38c   : > { %v1488_v57 = vpop.f32.mrb[7].mxu1  ;;  %1508 = vmatpush3.bf16.msra.mxu1 %v1573_v55 }
 0x38d   : > { %v1574_v57 = vld [vmem:[%s1905_s5 + $0x8] sm:$0xff]   ;;  %1509 = vmatprep.subr.bf16.mxu1 %v1617_v8 }
 0x390   : > { %1510 = vmatpush3.bf16.msra.mxu1 %v1574_v57 }
 0x391   : > { %v950_v58 = vpop.f32.mrb[8].mxu1  ;;  %1523 = vmatprep.subr.bf16.mxu1 %v1617_v8 }
 0x392   : > { %v1499_v59 = vpop.f32.mrb[9].mxu1  ;;  %v956_v60 = vsel %vm545_vm3, %v950_v58, -inf }
 0x393   : > { %957 = vmax.xlane.f32.xlu0 %v956_v60  ;;  %v953_v61 = vpop.f32.mrb[10].mxu1 }
 0x394   : > { %v1500_v62 = vpop.f32.mrb[11].mxu1 }
 0x40c   : > { %v594_v63 = vpop.xlane.xlu1 %593 }
 0x40d   : > { %v595_v1 = vsub.f32 %v586_v43, %v594_v63 }
 0x40f   : > { %v596_v2 = vmul.f32 1.442695, %v595_v1 }
 0x410   : > { %v712_v3 = vpop.xlane.xlu0 %711 }
 0x411   : > { %1587 = vpow2.f32 %v596_v2  ;;  %v713_v4 = vsub.f32 %v704_v48, %v712_v3 }
 0x413   : > { %v714_v5 = vmul.f32 1.442695, %v713_v4 }
 0x415   : > { %1589 = vpow2.f32 %v714_v5 }
 0x418   : > { %v835_v16 = vpop.xlane.xlu1 %834 }
 0x419   : > { %v836_v17 = vsub.f32 %v827_v53, %v835_v16 }
 0x41b   : > { %v1588_v6 = vpop.eup %1587  ;;  %v837_v18 = vmul.f32 1.442695, %v836_v17 }
 0x41c   : > { %v598_v7 = vsel %vm545_vm3, %v1588_v6, 0.0 }
 0x41d   : > { %599 = vadd.xlane.f32.xlu1 %v598_v7 }
 0x41f   : > { %v1590_v9 = vpop.eup %1589 }
 0x420   : > { %v958_v10 = vpop.xlane.xlu0 %957  ;;  %v716_v11 = vsel %vm545_vm3, %v1590_v9, 0.0 }
 0x421   : > { %v959_v12 = vsub.f32 %v950_v58, %v958_v10  ;;  %717 = vadd.xlane.f32.xlu0 %v716_v11 }
 0x423   : > { %v960_v13 = vmul.f32 1.442695, %v959_v12 }
 0x425   : > { %1591 = vpow2.f32 %v960_v13 }
 0x426   : > { %1593 = vpow2.f32 %v837_v18 }
 0x42e   : > { %604 = vrot.lane.b32.xlu1 %v1753_v29, %s1626_s17 }
 0x42f   : > { %v1592_v14 = vpop.eup %1591 }
 0x430   : > { %v962_v15 = vsel %vm545_vm3, %v1592_v14, 0.0  ;;  %v1594_v19 = vpop.eup %1593 }
 0x431   : > { %963 = vadd.xlane.f32.xlu0 %v962_v15  ;;  %v839_v20 = vsel %vm545_vm3, %v1594_v19, 0.0 }
 0x447   : > { %722 = vrot.lane.b32.xlu0 %v1751_v27, %s1627_s18  ;;  %s435_s18 = scalar_lea.vmem %s1913_s13, %s1369_s27 }
 0x452   : > { %840 = vadd.xlane.f32.xlu1 %v839_v20 }
 0x463   : > { %845 = vrot.lane.b32.xlu1 %v1758_v30, %s1628_s19 }
 0x467   : > { %968 = vrot.lane.b32.xlu1 %v1762_v31, %s1629_s20 }
 0x4aa   : > { %v600_v21 = vpop.xlane.xlu1 %599 }
 0x4ab   : > { %1595 = vrcp.f32 %v600_v21 }
 0x4ae   : > { %v605_v22 = vpop.permute.xlu1 %604  ;;  %v718_v24 = vpop.xlane.xlu0 %717 }
 0x4af   : > { %v611_v23 = vsel %vm609_vm4, %v605_v22, 0  ;;  %1597 = vrcp.f32 %v718_v24  ;;  %v1575_v22 = vld [vmem:[%s1909_s9] sm:$0xff]  }
 0x4b0   : > { %1466 = vmatpush3.bf16.msra.mxu0 %v611_v23 }
 0x4b1   : > { %1477 = vmatprep.subr.bf16.mxu0 %v1617_v8 }
 0x4b5   : > { %v1596_v25 = vpop.eup %1595 }
 0x4b6   : > { %v602_v26 = vmul.f32 %v1596_v25, %v1588_v6 }
 0x4b8   : > { %v603_v27 = vpack.c.bf16 %v602_v26, %v602_v26 }
 0x4b9   : > { %v1598_v28 = vpop.eup %1597 }
 0x4ba   : > { %1468 = vmatmul.mubr.msk.bf16.vlgmr.msra.gmra.mrb[8].mxu0 %vm545_vm3, %v603_v27  ;;  %v720_v30 = vmul.f32 %v1598_v28, %v1590_v9  ;;  %v1392_v9 = vld [vmem:[%s1906_s6] ss:$0 sm:$0xff] }
 0x4bb   : > { %1479 = vmatprep.mubr.msk.bf16.mxu0 %vm1618_vm1, %v1617_v8  ;;  %v1396_v27 = vld [vmem:[%s1907_s7] ss:$0 sm:$0xff] }
 0x4bc   : > { %v721_v33 = vpack.c.bf16 %v720_v30, %v720_v30 }
 0x4be   : > { %v964_v29 = vpop.xlane.xlu0 %963 }
 0x4c2   : > { %v723_v31 = vpop.permute.xlu0 %722 }
 0x4c3   : > { %v728_v32 = vsel %vm609_vm4, %v723_v31, 0 }
 0x4c4   : > { %1478 = vmatpush3.bf16.msra.mxu0 %v728_v32 }
 0x4c5   : > { %1489 = vmatprep.subr.bf16.mxu0 %v1617_v8 }
 0x4c7   : > { %1480 = vmatmul.mubr.msk.bf16.vlgmr.msra.gmra.mrb[12].mxu0 %vm545_vm3, %v721_v33  ;;  %v1577_v33 = vld [vmem:[%s1911_s11] sm:$0xff]  }
 0x4c8   : > { %1491 = vmatprep.mubr.msk.bf16.mxu0 %vm1618_vm1, %v1617_v8 }
 0x4df   : > { %v841_v34 = vpop.xlane.xlu1 %840 }
 0x4e0   : > { %1599 = vrcp.f32 %v841_v34  ;;  %v1578_v34 = vld [vmem:[%s1911_s11 + $0x8] sm:$0xff]  }
 0x4e1   : > { %1601 = vrcp.f32 %v964_v29  ;;  %v1397_v29 = vld [vmem:[%s1908_s8] ss:$0 sm:$0xff] }
 0x4e3   : > { %v846_v35 = vpop.permute.xlu1 %845 }
 0x4e4   : > { %v851_v36 = vsel %vm609_vm4, %v846_v35, 0  ;;  %v1579_v35 = vld [vmem:[%s1911_s11 + $0x10] sm:$0xff]  }
 0x4e5   : > { %1490 = vmatpush3.bf16.msra.mxu0 %v851_v36  ;;  %v1580_v36 = vld [vmem:[%s1911_s11 + $0x18] sm:$0xff]  }
 0x4e6   : > { %1501 = vmatprep.subr.bf16.mxu0 %v1617_v8 }
 0x4e7   : > { %v969_v39 = vpop.permute.xlu1 %968 }
 0x4e8   : > { %v974_v42 = vsel %vm609_vm4, %v969_v39, 0  ;;  %v1583_v39 = vld [vmem:[%s1911_s11 + $0x30] sm:$0xff]  }
 0x4ea   : > { %v1600_v37 = vpop.eup %1599 }
 0x4eb   : > { %v843_v38 = vmul.f32 %v1600_v37, %v1594_v19  ;;  %v1602_v41 = vpop.eup %1601  ;;  %v1581_v37 = vld [vmem:[%s1911_s11 + $0x20] sm:$0xff]  }
 0x4ec   : > { %v966_v43 = vmul.f32 %v1602_v41, %v1592_v14  ;;  %v1398_v41 = vld [vmem:[%s1910_s10] ss:$0 sm:$0xff] }
 0x4ed   : > { %v844_v40 = vpack.c.bf16 %v843_v38, %v843_v38  ;;  %v1582_v38 = vld [vmem:[%s1911_s11 + $0x28] sm:$0xff]  }
 0x4ee   : > { %v967_v44 = vpack.c.bf16 %v966_v43, %v966_v43 }
 0x4ef   : > { %1492 = vmatmul.mubr.msk.bf16.vlgmr.msra.gmra.mrb[16].mxu0 %vm545_vm3, %v844_v40  ;;  %v1584_v40 = vld [vmem:[%s1911_s11 + $0x38] sm:$0xff]  }
 0x4f0   : > { %1502 = vmatpush3.bf16.msra.mxu0 %v974_v42  ;;  %1503 = vmatprep.mubr.msk.bf16.mxu0 %vm1618_vm1, %v1617_v8 }
 0x4f1   : > { %1515 = vmatprep.subr.bf16.mxu0 %v1617_v8 }
 0x4f7   : > { %1504 = vmatmul.mubr.msk.bf16.vlgmr.msra.gmra.mrb[20].mxu0 %vm545_vm3, %v967_v44 }
 0x4f8   : > { %1519 = vmatprep.mubr.msk.bf16.mxu0 %vm1618_vm1, %v1617_v8  ;;  %1516 = vmatpush3.bf16.msra.mxu0 %v1575_v22 }
 0x4f9   : > { %1517 = vmatprep.subr.bf16.mxu0 %v1617_v8 }
 0x58d   : > { %v647_v45 = vpop.f32.mrb[8].mxu0 }
 0x58e   : > { %v653_v46 = vpack.c.bf16 %v647_v45, %v647_v45  ;;  %v1469_v47 = vpop.f32.mrb[9].mxu0 }
 0x58f   : > { %v650_v48 = vpop.f32.mrb[10].mxu0 }
 0x590   : > { %655 = vst.msk [vmem:[#allocation3] sm:$0xf] %vm654_vm5, %v653_v46  ;;  %v1470_v49 = vpop.f32.mrb[11].mxu0 }
 0x59a   : > { %v764_v50 = vpop.f32.mrb[12].mxu0 }
 0x59b   : > { %v1414_v51 = vpack.c.bf16 %v764_v50, %v764_v50  ;;  %v1481_v52 = vpop.f32.mrb[13].mxu0 }
 0x59c   : > { %v767_v53 = vpop.f32.mrb[14].mxu0 }
 0x59d   : > { %774 = vrot.lane.b32.xlu0 %v1414_v51, %s1630_s21  ;;  %v1482_v54 = vpop.f32.mrb[15].mxu0  ;;  %v1403_v53 = vld [vmem:[%s1912_s12] ss:$0 sm:$0xff] }
 0x5c2   : > { %v887_v56 = vpop.f32.mrb[16].mxu0 }
 0x5c3   : > { %v1415_v58 = vpack.c.bf16 %v887_v56, %v887_v56  ;;  %v1493_v59 = vpop.f32.mrb[17].mxu0 }
 0x5c4   : > { %v890_v60 = vpop.f32.mrb[18].mxu0 }
 0x5c5   : > { %897 = vrot.lane.b32.xlu1 %v1415_v58, %s1631_s29  ;;  %v1494_v61 = vpop.f32.mrb[19].mxu0 }
 0x5ca   : > { %v1010_v62 = vpop.f32.mrb[20].mxu0 }
 0x5cb   : > { %v1416_v63 = vpack.c.bf16 %v1010_v62, %v1010_v62  ;;  %v1505_v1 = vpop.f32.mrb[21].mxu0 }
 0x5cc   : > { %v1013_v2 = vpop.f32.mrb[22].mxu0 }
 0x5cd   : > { %1020 = vrot.lane.b32.xlu0 %v1416_v63, %s1632_s30  ;;  %v1506_v3 = vpop.f32.mrb[23].mxu0 }
 0x60f   : > { %v775_v4 = vpop.permute.xlu0 %774 }
 0x610   : > { %778 = vst.msk [vmem:[#allocation3] sm:$0xf] %vm777_vm6, %v775_v4 }
 0x637   : > { %v898_v5 = vpop.permute.xlu1 %897 }
 0x638   : > { %901 = vst.msk [vmem:[#allocation3] sm:$0xf] %vm900_vm7, %v898_v5 }
 0x63f   : > { %v1021_v6 = vpop.permute.xlu0 %1020 }
 0x640   : > { %1024 = vst.msk [vmem:[#allocation3] sm:$0xf] %vm1023_vm8, %v1021_v6 }
 0x647   : > { %v1025_v7 = vld [vmem:[#allocation3] sm:$0xf] }
 0x648   : > { %1512 = vmatmul.mubr.msk.bf16.vlgmr.msra.gmra.mrb[12].mxu1 %vm440_vm0, %v1025_v7 }
 0x649   : > { %1539 = vmatprep.mubr.msk.bf16.mxu1 %vm1618_vm1, %v1617_v8  ;;  %1524 = vmatpush3.bf16.msra.mxu1 %v1577_v33 }
 0x64a   : > { %1525 = vmatprep.subr.bf16.mxu1 %v1617_v8 }
 0x64d   : > { %1526 = vmatpush3.bf16.msra.mxu1 %v1578_v34 }
 0x64e   : > { %1527 = vmatprep.subr.bf16.mxu1 %v1617_v8 }
 0x651   : > { %1528 = vmatpush3.bf16.msra.mxu1 %v1579_v35 }
 0x652   : > { %1529 = vmatprep.subr.bf16.mxu1 %v1617_v8 }
 0x655   : > { %1530 = vmatpush3.bf16.msra.mxu1 %v1580_v36 }
 0x656   : > { %1531 = vmatprep.subr.bf16.mxu1 %v1617_v8 }
 0x659   : > { %1532 = vmatpush3.bf16.msra.mxu1 %v1581_v37 }
 0x65a   : > { %1533 = vmatprep.subr.bf16.mxu1 %v1617_v8 }
 0x65d   : > { %1534 = vmatpush3.bf16.msra.mxu1 %v1582_v38 }
 0x65e   : > { %1535 = vmatprep.subr.bf16.mxu1 %v1617_v8 }
 0x661   : > { %1536 = vmatpush3.bf16.msra.mxu1 %v1583_v39 }
 0x662   : > { %1537 = vmatprep.subr.bf16.mxu1 %v1617_v8 }
 0x665   : > { %1538 = vmatpush3.bf16.msra.mxu1 %v1584_v40 }
 0x71b   : > { %v1086_v10 = vpop.f32.mrb[12].mxu1 }
 0x71c   : > { %v1087_v11 = vadd.f32 %v1392_v9, %v1086_v10  ;;  %v1513_v12 = vpop.f32.mrb[13].mxu1 }
 0x71d   : > { %v1089_v13 = vpop.f32.mrb[14].mxu1 }
 0x71e   : > { %v1833_v14 = vadd.f32 %v1087_v11, %v1719_v0  ;;  %v1514_v15 = vpop.f32.mrb[15].mxu1  ;;  %v1576_v0 = vld [vmem:[%s1909_s9 + $0x8] sm:$0xff]  }
 0x71f   : > { %1518 = vmatpush3.bf16.msra.mxu0 %v1576_v0 }
 0x720   : > { %v1095_v16 = vsel %vm440_vm0, %v1833_v14, 0.0 }
 0x721   : > { %1096 = vadd.xlane.f32.xlu1 %v1095_v16 }
 0x7ae   : > { %v1097_v17 = vpop.xlane.xlu1 %1096 }
 0x7af   : > { %v1098_v18 = vmul.f32 0.03125, %v1097_v17 }
 0x7b1   : > { %v1099_v19 = vsub.f32 %v1833_v14, %v1098_v18 }
 0x7b3   : > { %v1100_v20 = vmul.f32 %v1099_v19, %v1099_v19 }
 0x7b5   : > { %v1101_v21 = vsel %vm440_vm0, %v1100_v20, 0.0 }
 0x7b6   : > { %1102 = vadd.xlane.f32.xlu0 %v1101_v21 }
 0x843   : > { %v1103_v23 = vpop.xlane.xlu0 %1102 }
 0x844   : > { %v1104_v24 = vmul.f32 0.03125, %v1103_v23 }
 0x846   : > { %v1105_v25 = vadd.f32 1e-05, %v1104_v24 }
 0x848   : > { %1603 = vrsqrt.f32 %v1105_v25 }
 0x852   : > { %v1604_v26 = vpop.eup %1603 }
 0x853   : > { %v1107_v28 = vmul.f32 %v1604_v26, %v1099_v19 }
 0x855   : > { %v1114_v30 = vmul.f32 %v1396_v27, %v1107_v28 }
 0x857   : > { %v1121_v31 = vadd.f32 %v1397_v29, %v1114_v30 }
 0x859   : > { %v1122_v32 = vpack.c.bf16 %v1121_v31, %v1121_v31 }
 0x85b   : > { %1520 = vmatmul.mubr.msk.bf16.vlgmr.msra.gmra.mrb[24].mxu0 %vm440_vm0, %v1122_v32 }
 0x92e   : > { %v1183_v42 = vpop.f32.mrb[24].mxu0 }
 0x92f   : > { %v1184_v43 = vadd.f32 %v1398_v41, %v1183_v42  ;;  %v1521_v44 = vpop.f32.mrb[25].mxu0 }
 0x930   : > { %v1186_v45 = vpop.f32.mrb[26].mxu0 }
 0x931   : > { %v1402_v46 = vmul.f32 -1.702, %v1184_v43  ;;  %v1522_v47 = vpop.f32.mrb[27].mxu0 }
 0x933   : > { %v1191_v48 = vmul.f32 1.442695, %v1402_v46 }
 0x935   : > { %1605 = vpow2.f32 %v1191_v48 }
 0x93f   : > { %v1606_v49 = vpop.eup %1605 }
 0x940   : > { %v1193_v8 = vadd.f32 1.0, %v1606_v49 }
 0x942   : > { %1607 = vrcp.f32 %v1193_v8 }
 0x94c   : > { %v1608_v50 = vpop.eup %1607 }
 0x94d   : > { %v1196_v51 = vmul.f32 %v1608_v50, %v1184_v43 }
 0x94f   : > { %v1197_v52 = vpack.c.bf16 %v1196_v51, %v1196_v51 }
 0x951   : > { %1540 = vmatmul.mubr.bf16.vlgmr.msra.gmra.mrb[16].mxu1 %v1197_v52 }
 0xa24   : > { %v1303_v54 = vpop.f32.mrb[16].mxu1 }
 0xa25   : > { %v1304_v55 = vadd.f32 %v1403_v53, %v1303_v54  ;;  %v1541_v56 = vpop.f32.mrb[17].mxu1 }
 0xa26   : > { %v1306_v57 = vpop.f32.mrb[18].mxu1 }
 0xa27   : > { %v1309_v58 = vadd.f32 %v1304_v55, %v1833_v14  ;;  %v1542_v59 = vpop.f32.mrb[19].mxu1 }
 0xa29   : > { %1310 = vst.msk [vmem:[%s435_s18] sm:$0xff] %vm440_vm0, %v1309_v58 }
 0xa2a PF: > { %s23_s25 = sadd.s32 1, %s1615_s25  }
 0xa2b   : > { %p20_p4 = scmp.ge.s32.totalorder %s23_s25, 4  }
 0xa2d   :  { %22 = sbr.rel (!%p20_p4) target bundleno = 1 (0x1), region = 102 }

</bundles_post_ra>
